<compile_context>
chip_gen: v6e
topology: v6e:2x2x1
jax: 0.10.0
libtpu: 0.0.40
codegen_flags: <defaults>
</compile_context>

<pallas_src>
import math

import jax
import jax.numpy as jnp
from jax.experimental import pallas as pl
from jax.experimental.pallas import tpu as pltpu


def _round_up(x, m):
    return ((x + m - 1) // m) * m


def conv_bn_act(x, weight, gamma, beta, *, stride=1, padding=0, eps=1e-5):
    """x: [N, C, H, W] f32; weight: [OC, C, KH, KW]; gamma/beta: [OC]. Returns NCHW f32."""
    N, C, H, W = x.shape
    OC, _, KH, KW = weight.shape
    OH = (H + 2 * padding - KH) // stride + 1
    OW = (W + 2 * padding - KW) // stride + 1
    S = OH * OW            # spatial rows per image (pass-1 matmul M)
    M = N * S              # total rows for the batch statistics

    OCp = _round_up(OC, 128)
    TOC = 256 if OCp % 256 == 0 else 128   # lane-dense OC tile (whole MXU passes on v6e/v7x)
    n_oc = OCp // TOC

    # ---- cheap XLA prep: NHWC bf16 + spatial zero-pad; weights -> [KH, KW, C, OCp] bf16 ----
    x_nhwc = jnp.transpose(x, (0, 2, 3, 1)).astype(jnp.bfloat16)
    x_pad = jnp.pad(x_nhwc, ((0, 0), (padding, padding), (padding, padding), (0, 0)))
    Hp, Wp = H + 2 * padding, W + 2 * padding

    w_r = jnp.transpose(weight, (2, 3, 1, 0)).astype(jnp.bfloat16)          # [KH, KW, C, OC]
    w_p = jnp.zeros((KH, KW, C, OCp), jnp.bfloat16).at[..., :OC].set(w_r)

    # ---- Pass 1: in-kernel patch assembly + MXU matmul + per-channel sum / sum-of-squares ----
    def conv_stats_kernel(x_ref, w_ref, y_ref, sum_ref, sq_ref):
        x_img = x_ref[0]                                        # (Hp, Wp, C) bf16, one image
        acc = jnp.zeros((S, TOC), jnp.float32)
        for kh in range(KH):                                    # KH*KW shifted-window matmuls
            for kw in range(KW):
                win = x_img[kh:kh + stride * (OH - 1) + 1:stride,
                            kw:kw + stride * (OW - 1) + 1:stride, :]   # (OH, OW, C)
                win = win.reshape(S, C)
                acc = acc + jnp.dot(win, w_ref[kh, kw],
                                    preferred_element_type=jnp.float32)

        @pl.when(pl.program_id(1) == 0)
        def _():
            sum_ref[...] = jnp.zeros_like(sum_ref)
            sq_ref[...] = jnp.zeros_like(sq_ref)

        # Batch statistics from the f32 accumulator (before the bf16 cast).
        sum_ref[...] += jnp.sum(acc, axis=0, keepdims=True)
        sq_ref[...] += jnp.sum(acc * acc, axis=0, keepdims=True)

        # Store channel-major bf16 so pass 2 can write NCHW-flat with no epilogue transpose.
        y_ref[0] = acc.T.astype(jnp.bfloat16)

    cost1 = pl.CostEstimate(
        flops=2 * N * S * C * KH * KW * OCp,
        transcendentals=0,
        bytes_accessed=(n_oc * N * Hp * Wp * C * 2 + KH * KW * C * OCp * 2
                        + N * OCp * S * 2 + 2 * OCp * 4),
    )
    y, ysum, ysq = pl.pallas_call(
        conv_stats_kernel,
        out_shape=(
            jax.ShapeDtypeStruct((N, OCp, S), jnp.bfloat16),   # conv result, channel-major
            jax.ShapeDtypeStruct((1, OCp), jnp.float32),       # sum
            jax.ShapeDtypeStruct((1, OCp), jnp.float32),       # sum of squares
        ),
        grid=(n_oc, N),
        in_specs=[
            pl.BlockSpec((1, Hp, Wp, C), lambda joc, n: (n, 0, 0, 0)),
            pl.BlockSpec((KH, KW, C, TOC), lambda joc, n: (0, 0, 0, joc)),
        ],
        out_specs=(
            pl.BlockSpec((1, TOC, S), lambda joc, n: (n, joc, 0)),
            pl.BlockSpec((1, TOC), lambda joc, n: (0, joc)),   # resident across the n axis
            pl.BlockSpec((1, TOC), lambda joc, n: (0, joc)),
        ),
        compiler_params=pltpu.CompilerParams(
            dimension_semantics=("parallel", "arbitrary"),     # stats reduce over batch axis
        ),
        cost_estimate=cost1,
    )(x_pad, w_p)

    # ---- BN batch statistics -> per-channel affine (tiny [OCp] XLA math) ----
    # NOTE: E[x^2] - mean^2 in f32 accumulation; adequate here — a shifted-sum / Welford
    # combine would be more robust for very large, strongly off-center batches.
    mean = ysum[0] / M
    var = jnp.maximum(ysq[0] / M - mean * mean, 0.0)
    inv = jax.lax.rsqrt(var + eps)
    gamma_p = jnp.zeros((OCp,), jnp.float32).at[:OC].set(gamma.astype(jnp.float32))
    beta_p = jnp.zeros((OCp,), jnp.float32).at[:OC].set(beta.astype(jnp.float32))
    scale = (gamma_p * inv).reshape(OCp, 1)
    shift = (beta_p - mean * gamma_p * inv).reshape(OCp, 1)
    # TODO(synk): BatchNorm2d running_mean/running_var momentum update is not emitted
    # (only the forward activation is produced, matching the module's return value).

    # ---- Pass 2: BN affine + tanh-GELU, channel-major -> NCHW-flat f32 output ----
    TS = S if S <= 2048 else 2048          # spatial tile (multiple of 128 when tiled)
    n_s = pl.cdiv(S, TS)

    def bn_gelu_kernel(y_ref, scale_ref, shift_ref, out_ref):
        z = y_ref[0].astype(jnp.float32) * scale_ref[...] + shift_ref[...]
        c = 0.7978845608028654  # sqrt(2/pi)
        g = 0.5 * z * (1.0 + jnp.tanh(c * (z + 0.044715 * (z * z * z))))
        out_ref[0] = g[:OC].astype(out_ref.dtype)

    cost2 = pl.CostEstimate(
        flops=10 * N * OCp * S,
        transcendentals=N * OCp * S,
        bytes_accessed=N * OCp * S * 2 + N * OC * S * 4 + 2 * OCp * 4,
    )
    out = pl.pallas_call(
        bn_gelu_kernel,
        out_shape=jax.ShapeDtypeStruct((N, OC, S), jnp.float32),
        grid=(N, n_s),
        in_specs=[
            pl.BlockSpec((1, OCp, TS), lambda n, j: (n, 0, j)),
            pl.BlockSpec((OCp, 1), lambda n, j: (0, 0)),
            pl.BlockSpec((OCp, 1), lambda n, j: (0, 0)),
        ],
        out_specs=pl.BlockSpec((1, OC, TS), lambda n, j: (n, 0, j)),
        compiler_params=pltpu.CompilerParams(
            dimension_semantics=("parallel", "parallel"),      # independent tiles -> megacore
        ),
        cost_estimate=cost2,
    )(y, scale, shift)

    # Contiguous reshape only (no transpose, no slice): [N, OC, OH*OW] -> [N, OC, OH, OW].
    return out.reshape(N, OC, OH, OW)


# --------------- Reference + test ----------------------------------------------------------


def _reference(x, weight, gamma, beta, *, stride=1, padding=0, eps=1e-5):
    y = jax.lax.conv_general_dilated(
        x, weight, window_strides=(stride, stride),
        padding=[(padding, padding), (padding, padding)],
        dimension_numbers=("NCHW", "OIHW", "NCHW"))
    mean = jnp.mean(y, axis=(0, 2, 3), keepdims=True)
    var = jnp.mean((y - mean) ** 2, axis=(0, 2, 3), keepdims=True)
    z = (y - mean) * jax.lax.rsqrt(var + eps)
    z = z * gamma.reshape(1, -1, 1, 1) + beta.reshape(1, -1, 1, 1)
    c = math.sqrt(2.0 / math.pi)
    return 0.5 * z * (1.0 + jnp.tanh(c * (z + 0.044715 * z ** 3)))


if __name__ == "__main__":
    key = jax.random.PRNGKey(0)
    k_x, k_w, k_g, k_b = jax.random.split(key, 4)

    N, C, H, W = 2, 4, 16, 16
    OC, KH, KW = 8, 3, 3
    stride, padding = 1, 1

    x = jax.random.normal(k_x, (N, C, H, W), dtype=jnp.float32)
    fan_in = C * KH * KW
    weight = jax.random.uniform(k_w, (OC, C, KH, KW), dtype=jnp.float32,
                                minval=-1.0 / math.sqrt(fan_in),
                                maxval=1.0 / math.sqrt(fan_in))
    gamma = 1.0 + 0.1 * jax.random.normal(k_g, (OC,), dtype=jnp.float32)
    beta = 0.1 * jax.random.normal(k_b, (OC,), dtype=jnp.float32)

    out = conv_bn_act(x, weight, gamma, beta, stride=stride, padding=padding)
    out = jax.block_until_ready(out)
    assert out.shape == (N, OC, H, W)

    # The kernel deliberately keeps conv operands and the conv intermediate in bf16
    # (MXU-native, half HBM traffic). Compare against a reference fed the same
    # bf16-rounded operands so the check isolates kernel correctness from that
    # intentional quantization (tolerance covers the bf16 y-storage rounding).
    x_q = x.astype(jnp.bfloat16).astype(jnp.float32)
    w_q = weight.astype(jnp.bfloat16).astype(jnp.float32)
    ref_q = _reference(x_q, w_q, gamma, beta, stride=stride, padding=padding)
    err = float(jnp.max(jnp.abs(out - ref_q)))
    assert err < 3e-2, f"mismatch vs bf16-rounded reference: {err}"

    # Loose sanity check against the full-precision reference as well.
    ref_f32 = _reference(x, weight, gamma, beta, stride=stride, padding=padding)
    err32 = float(jnp.max(jnp.abs(out - ref_f32)))
    assert err32 < 1e-1, f"mismatch vs f32 reference: {err32}"

    print("KERNEL_OK")
</pallas_src>

<mosaic_0001>
module attributes {stable_mosaic.version = 11 : i64} {
  func.func @conv_stats_kernel(%arg0: i32, %arg1: i32, %arg2: memref<1x18x18x4xbf16, #tpu.memory_space<vmem>>, %arg3: memref<3x3x4x128xbf16, #tpu.memory_space<vmem>>, %arg4: memref<1x128x256xbf16, #tpu.memory_space<vmem>>, %arg5: memref<1x128xf32, #tpu.memory_space<vmem>>, %arg6: memref<1x128xf32, #tpu.memory_space<vmem>>) attributes {dimension_semantics = [#tpu.dimension_semantics<parallel>, #tpu.dimension_semantics<arbitrary>], iteration_bounds = array<i64: 1, 2>, scalar_prefetch = 0 : i64, scratch_operands = 0 : i64, tpu.core_type = #tpu.core_type<tc>, window_params = [{transform_indices = @transform_0, window_bounds = array<i64: 1, 18, 18, 4>}, {transform_indices = @transform_1, window_bounds = array<i64: 3, 3, 4, 128>}, {transform_indices = @transform_2, window_bounds = array<i64: 1, 128, 256>}, {transform_indices = @transform_3, window_bounds = array<i64: 1, 128>}, {transform_indices = @transform_4, window_bounds = array<i64: 1, 128>}]} {
    %c0 = arith.constant 0 : index
    %c0_0 = arith.constant 0 : index
    %c0_1 = arith.constant 0 : index
    %c0_2 = arith.constant 0 : index
    %0 = vector.load %arg2[%c0, %c0_0, %c0_1, %c0_2] : memref<1x18x18x4xbf16, #tpu.memory_space<vmem>>, vector<1x18x18x4xbf16>
    %1 = vector.shape_cast %0 : vector<1x18x18x4xbf16> to vector<18x18x4xbf16>
    %cst = arith.constant 0.000000e+00 : f32
    %2 = vector.broadcast %cst : f32 to vector<256x128xf32>
    %3 = vector.extract_strided_slice %1 {offsets = [0, 0, 0], sizes = [16, 16, 4], strides = [1, 1, 1]} : vector<18x18x4xbf16> to vector<16x16x4xbf16>
    %4 = vector.shape_cast %3 : vector<16x16x4xbf16> to vector<256x4xbf16>
    %c0_3 = arith.constant 0 : index
    %c0_4 = arith.constant 0 : index
    %c0_5 = arith.constant 0 : index
    %c0_6 = arith.constant 0 : index
    %5 = vector.load %arg3[%c0_3, %c0_4, %c0_5, %c0_6] : memref<3x3x4x128xbf16, #tpu.memory_space<vmem>>, vector<1x1x4x128xbf16>
    %6 = vector.shape_cast %5 : vector<1x1x4x128xbf16> to vector<4x128xbf16>
    %cst_7 = arith.constant dense<0.000000e+00> : vector<256x128xf32>
    %7 = tpu.matmul %4, %6, %cst_7 {dimension_numbers = #tpu.dot_dimension_numbers<[1], [0], [0], [1], [0, 0, 1, 1], [], []>} : vector<256x4xbf16>, vector<4x128xbf16>, vector<256x128xf32> -> vector<256x128xf32>
    %8 = arith.addf %2, %7 : vector<256x128xf32>
    %9 = vector.extract_strided_slice %1 {offsets = [0, 1, 0], sizes = [16, 16, 4], strides = [1, 1, 1]} : vector<18x18x4xbf16> to vector<16x16x4xbf16>
    %10 = vector.shape_cast %9 : vector<16x16x4xbf16> to vector<256x4xbf16>
    %c0_8 = arith.constant 0 : index
    %c1 = arith.constant 1 : index
    %c0_9 = arith.constant 0 : index
    %c0_10 = arith.constant 0 : index
    %11 = vector.load %arg3[%c0_8, %c1, %c0_9, %c0_10] : memref<3x3x4x128xbf16, #tpu.memory_space<vmem>>, vector<1x1x4x128xbf16>
    %12 = vector.shape_cast %11 : vector<1x1x4x128xbf16> to vector<4x128xbf16>
    %cst_11 = arith.constant dense<0.000000e+00> : vector<256x128xf32>
    %13 = tpu.matmul %10, %12, %cst_11 {dimension_numbers = #tpu.dot_dimension_numbers<[1], [0], [0], [1], [0, 0, 1, 1], [], []>} : vector<256x4xbf16>, vector<4x128xbf16>, vector<256x128xf32> -> vector<256x128xf32>
    %14 = arith.addf %8, %13 : vector<256x128xf32>
    %15 = vector.extract_strided_slice %1 {offsets = [0, 2, 0], sizes = [16, 16, 4], strides = [1, 1, 1]} : vector<18x18x4xbf16> to vector<16x16x4xbf16>
    %16 = vector.shape_cast %15 : vector<16x16x4xbf16> to vector<256x4xbf16>
    %c0_12 = arith.constant 0 : index
    %c2 = arith.constant 2 : index
    %c0_13 = arith.constant 0 : index
    %c0_14 = arith.constant 0 : index
    %17 = vector.load %arg3[%c0_12, %c2, %c0_13, %c0_14] : memref<3x3x4x128xbf16, #tpu.memory_space<vmem>>, vector<1x1x4x128xbf16>
    %18 = vector.shape_cast %17 : vector<1x1x4x128xbf16> to vector<4x128xbf16>
    %cst_15 = arith.constant dense<0.000000e+00> : vector<256x128xf32>
    %19 = tpu.matmul %16, %18, %cst_15 {dimension_numbers = #tpu.dot_dimension_numbers<[1], [0], [0], [1], [0, 0, 1, 1], [], []>} : vector<256x4xbf16>, vector<4x128xbf16>, vector<256x128xf32> -> vector<256x128xf32>
    %20 = arith.addf %14, %19 : vector<256x128xf32>
    %21 = vector.extract_strided_slice %1 {offsets = [1, 0, 0], sizes = [16, 16, 4], strides = [1, 1, 1]} : vector<18x18x4xbf16> to vector<16x16x4xbf16>
    %22 = vector.shape_cast %21 : vector<16x16x4xbf16> to vector<256x4xbf16>
    %c1_16 = arith.constant 1 : index
    %c0_17 = arith.constant 0 : index
    %c0_18 = arith.constant 0 : index
    %c0_19 = arith.constant 0 : index
    %23 = vector.load %arg3[%c1_16, %c0_17, %c0_18, %c0_19] : memref<3x3x4x128xbf16, #tpu.memory_space<vmem>>, vector<1x1x4x128xbf16>
    %24 = vector.shape_cast %23 : vector<1x1x4x128xbf16> to vector<4x128xbf16>
    %cst_20 = arith.constant dense<0.000000e+00> : vector<256x128xf32>
    %25 = tpu.matmul %22, %24, %cst_20 {dimension_numbers = #tpu.dot_dimension_numbers<[1], [0], [0], [1], [0, 0, 1, 1], [], []>} : vector<256x4xbf16>, vector<4x128xbf16>, vector<256x128xf32> -> vector<256x128xf32>
    %26 = arith.addf %20, %25 : vector<256x128xf32>
    %27 = vector.extract_strided_slice %1 {offsets = [1, 1, 0], sizes = [16, 16, 4], strides = [1, 1, 1]} : vector<18x18x4xbf16> to vector<16x16x4xbf16>
    %28 = vector.shape_cast %27 : vector<16x16x4xbf16> to vector<256x4xbf16>
    %c1_21 = arith.constant 1 : index
    %c1_22 = arith.constant 1 : index
    %c0_23 = arith.constant 0 : index
    %c0_24 = arith.constant 0 : index
    %29 = vector.load %arg3[%c1_21, %c1_22, %c0_23, %c0_24] : memref<3x3x4x128xbf16, #tpu.memory_space<vmem>>, vector<1x1x4x128xbf16>
    %30 = vector.shape_cast %29 : vector<1x1x4x128xbf16> to vector<4x128xbf16>
    %cst_25 = arith.constant dense<0.000000e+00> : vector<256x128xf32>
    %31 = tpu.matmul %28, %30, %cst_25 {dimension_numbers = #tpu.dot_dimension_numbers<[1], [0], [0], [1], [0, 0, 1, 1], [], []>} : vector<256x4xbf16>, vector<4x128xbf16>, vector<256x128xf32> -> vector<256x128xf32>
    %32 = arith.addf %26, %31 : vector<256x128xf32>
    %33 = vector.extract_strided_slice %1 {offsets = [1, 2, 0], sizes = [16, 16, 4], strides = [1, 1, 1]} : vector<18x18x4xbf16> to vector<16x16x4xbf16>
    %34 = vector.shape_cast %33 : vector<16x16x4xbf16> to vector<256x4xbf16>
    %c1_26 = arith.constant 1 : index
    %c2_27 = arith.constant 2 : index
    %c0_28 = arith.constant 0 : index
    %c0_29 = arith.constant 0 : index
    %35 = vector.load %arg3[%c1_26, %c2_27, %c0_28, %c0_29] : memref<3x3x4x128xbf16, #tpu.memory_space<vmem>>, vector<1x1x4x128xbf16>
    %36 = vector.shape_cast %35 : vector<1x1x4x128xbf16> to vector<4x128xbf16>
    %cst_30 = arith.constant dense<0.000000e+00> : vector<256x128xf32>
    %37 = tpu.matmul %34, %36, %cst_30 {dimension_numbers = #tpu.dot_dimension_numbers<[1], [0], [0], [1], [0, 0, 1, 1], [], []>} : vector<256x4xbf16>, vector<4x128xbf16>, vector<256x128xf32> -> vector<256x128xf32>
    %38 = arith.addf %32, %37 : vector<256x128xf32>
    %39 = vector.extract_strided_slice %1 {offsets = [2, 0, 0], sizes = [16, 16, 4], strides = [1, 1, 1]} : vector<18x18x4xbf16> to vector<16x16x4xbf16>
    %40 = vector.shape_cast %39 : vector<16x16x4xbf16> to vector<256x4xbf16>
    %c2_31 = arith.constant 2 : index
    %c0_32 = arith.constant 0 : index
    %c0_33 = arith.constant 0 : index
    %c0_34 = arith.constant 0 : index
    %41 = vector.load %arg3[%c2_31, %c0_32, %c0_33, %c0_34] : memref<3x3x4x128xbf16, #tpu.memory_space<vmem>>, vector<1x1x4x128xbf16>
    %42 = vector.shape_cast %41 : vector<1x1x4x128xbf16> to vector<4x128xbf16>
    %cst_35 = arith.constant dense<0.000000e+00> : vector<256x128xf32>
    %43 = tpu.matmul %40, %42, %cst_35 {dimension_numbers = #tpu.dot_dimension_numbers<[1], [0], [0], [1], [0, 0, 1, 1], [], []>} : vector<256x4xbf16>, vector<4x128xbf16>, vector<256x128xf32> -> vector<256x128xf32>
    %44 = arith.addf %38, %43 : vector<256x128xf32>
    %45 = vector.extract_strided_slice %1 {offsets = [2, 1, 0], sizes = [16, 16, 4], strides = [1, 1, 1]} : vector<18x18x4xbf16> to vector<16x16x4xbf16>
    %46 = vector.shape_cast %45 : vector<16x16x4xbf16> to vector<256x4xbf16>
    %c2_36 = arith.constant 2 : index
    %c1_37 = arith.constant 1 : index
    %c0_38 = arith.constant 0 : index
    %c0_39 = arith.constant 0 : index
    %47 = vector.load %arg3[%c2_36, %c1_37, %c0_38, %c0_39] : memref<3x3x4x128xbf16, #tpu.memory_space<vmem>>, vector<1x1x4x128xbf16>
    %48 = vector.shape_cast %47 : vector<1x1x4x128xbf16> to vector<4x128xbf16>
    %cst_40 = arith.constant dense<0.000000e+00> : vector<256x128xf32>
    %49 = tpu.matmul %46, %48, %cst_40 {dimension_numbers = #tpu.dot_dimension_numbers<[1], [0], [0], [1], [0, 0, 1, 1], [], []>} : vector<256x4xbf16>, vector<4x128xbf16>, vector<256x128xf32> -> vector<256x128xf32>
    %50 = arith.addf %44, %49 : vector<256x128xf32>
    %51 = vector.extract_strided_slice %1 {offsets = [2, 2, 0], sizes = [16, 16, 4], strides = [1, 1, 1]} : vector<18x18x4xbf16> to vector<16x16x4xbf16>
    %52 = vector.shape_cast %51 : vector<16x16x4xbf16> to vector<256x4xbf16>
    %c2_41 = arith.constant 2 : index
    %c2_42 = arith.constant 2 : index
    %c0_43 = arith.constant 0 : index
    %c0_44 = arith.constant 0 : index
    %53 = vector.load %arg3[%c2_41, %c2_42, %c0_43, %c0_44] : memref<3x3x4x128xbf16, #tpu.memory_space<vmem>>, vector<1x1x4x128xbf16>
    %54 = vector.shape_cast %53 : vector<1x1x4x128xbf16> to vector<4x128xbf16>
    %cst_45 = arith.constant dense<0.000000e+00> : vector<256x128xf32>
    %55 = tpu.matmul %52, %54, %cst_45 {dimension_numbers = #tpu.dot_dimension_numbers<[1], [0], [0], [1], [0, 0, 1, 1], [], []>} : vector<256x4xbf16>, vector<4x128xbf16>, vector<256x128xf32> -> vector<256x128xf32>
    %56 = arith.addf %50, %55 : vector<256x128xf32>
    %c0_i32 = arith.constant 0 : i32
    %57 = arith.cmpi eq, %arg1, %c0_i32 : i32
    %58 = arith.extui %57 : i1 to i32
    %c0_i32_46 = arith.constant 0 : i32
    %59 = arith.cmpi ne, %58, %c0_i32_46 : i32
    scf.if %59 {
      %cst_60 = arith.constant 0.000000e+00 : f32
      %76 = vector.broadcast %cst_60 : f32 to vector<1x128xf32>
      %c0_61 = arith.constant 0 : index
      %c0_62 = arith.constant 0 : index
      %77 = vector.load %arg5[%c0_61, %c0_62] : memref<1x128xf32, #tpu.memory_space<vmem>>, vector<1x128xf32>
      tpu.vector_store %arg5[%c0_61, %c0_62], %76 {strides = array<i32>} : memref<1x128xf32, #tpu.memory_space<vmem>>, vector<1x128xf32>,
      %cst_63 = arith.constant 0.000000e+00 : f32
      %78 = vector.broadcast %cst_63 : f32 to vector<1x128xf32>
      %c0_64 = arith.constant 0 : index
      %c0_65 = arith.constant 0 : index
      %79 = vector.load %arg6[%c0_64, %c0_65] : memref<1x128xf32, #tpu.memory_space<vmem>>, vector<1x128xf32>
      tpu.vector_store %arg6[%c0_64, %c0_65], %78 {strides = array<i32>} : memref<1x128xf32, #tpu.memory_space<vmem>>, vector<1x128xf32>,
    } else {
    }
    %c0_47 = arith.constant 0 : index
    %c0_48 = arith.constant 0 : index
    %60 = vector.load %arg5[%c0_47, %c0_48] : memref<1x128xf32, #tpu.memory_space<vmem>>, vector<1x128xf32>
    %cst_49 = arith.constant dense<0.000000e+00> : vector<128xf32>
    %61 = vector.multi_reduction <add>, %56, %cst_49 [0] : vector<256x128xf32> to vector<128xf32>
    %62 = vector.shape_cast %61 : vector<128xf32> to vector<1x128xf32>
    %63 = arith.addf %60, %62 : vector<1x128xf32>
    %c0_50 = arith.constant 0 : index
    %c0_51 = arith.constant 0 : index
    %64 = vector.load %arg5[%c0_50, %c0_51] : memref<1x128xf32, #tpu.memory_space<vmem>>, vector<1x128xf32>
    tpu.vector_store %arg5[%c0_50, %c0_51], %63 {strides = array<i32>} : memref<1x128xf32, #tpu.memory_space<vmem>>, vector<1x128xf32>,
    %c0_52 = arith.constant 0 : index
    %c0_53 = arith.constant 0 : index
    %65 = vector.load %arg6[%c0_52, %c0_53] : memref<1x128xf32, #tpu.memory_space<vmem>>, vector<1x128xf32>
    %66 = arith.mulf %56, %56 : vector<256x128xf32>
    %cst_54 = arith.constant dense<0.000000e+00> : vector<128xf32>
    %67 = vector.multi_reduction <add>, %66, %cst_54 [0] : vector<256x128xf32> to vector<128xf32>
    %68 = vector.shape_cast %67 : vector<128xf32> to vector<1x128xf32>
    %69 = arith.addf %65, %68 : vector<1x128xf32>
    %c0_55 = arith.constant 0 : index
    %c0_56 = arith.constant 0 : index
    %70 = vector.load %arg6[%c0_55, %c0_56] : memref<1x128xf32, #tpu.memory_space<vmem>>, vector<1x128xf32>
    tpu.vector_store %arg6[%c0_55, %c0_56], %69 {strides = array<i32>} : memref<1x128xf32, #tpu.memory_space<vmem>>, vector<1x128xf32>,
    %71 = tpu.transpose %56, [1, 0] : vector<256x128xf32> -> vector<128x256xf32>
    %72 = arith.truncf %71 : vector<128x256xf32> to vector<128x256xbf16>
    %c0_57 = arith.constant 0 : index
    %c0_58 = arith.constant 0 : index
    %c0_59 = arith.constant 0 : index
    %73 = vector.load %arg4[%c0_57, %c0_58, %c0_59] : memref<1x128x256xbf16, #tpu.memory_space<vmem>>, vector<1x128x256xbf16>
    %74 = vector.shape_cast %73 : vector<1x128x256xbf16> to vector<128x256xbf16>
    %75 = vector.shape_cast %72 : vector<128x256xbf16> to vector<1x128x256xbf16>
    tpu.vector_store %arg4[%c0_57, %c0_58, %c0_59], %75 {strides = array<i32>} : memref<1x128x256xbf16, #tpu.memory_space<vmem>>, vector<1x128x256xbf16>,
    return
  }
  func.func @transform_0(%arg0: i32, %arg1: i32) -> (i32, i32, i32, i32) {
    %c0_i32 = arith.constant 0 : i32
    %c0_i32_0 = arith.constant 0 : i32
    %c0_i32_1 = arith.constant 0 : i32
    %c0_i32_2 = arith.constant 0 : i32
    return %arg1, %c0_i32, %c0_i32_0, %c0_i32_1 : i32, i32, i32, i32
  }
  func.func @transform_1(%arg0: i32, %arg1: i32) -> (i32, i32, i32, i32) {
    %c0_i32 = arith.constant 0 : i32
    %c0_i32_0 = arith.constant 0 : i32
    %c0_i32_1 = arith.constant 0 : i32
    %c0_i32_2 = arith.constant 0 : i32
    return %c0_i32, %c0_i32_0, %c0_i32_1, %arg0 : i32, i32, i32, i32
  }
  func.func @transform_2(%arg0: i32, %arg1: i32) -> (i32, i32, i32) {
    %c0_i32 = arith.constant 0 : i32
    %c0_i32_0 = arith.constant 0 : i32
    return %arg1, %arg0, %c0_i32 : i32, i32, i32
  }
  func.func @transform_3(%arg0: i32, %arg1: i32) -> (i32, i32) {
    %c0_i32 = arith.constant 0 : i32
    %c0_i32_0 = arith.constant 0 : i32
    return %c0_i32, %arg0 : i32, i32
  }
  func.func @transform_4(%arg0: i32, %arg1: i32) -> (i32, i32) {
    %c0_i32 = arith.constant 0 : i32
    %c0_i32_0 = arith.constant 0 : i32
    return %c0_i32, %arg0 : i32, i32
  }
}

</mosaic_0001>

<bundles_post_ra>
// kernel: tpu_custom_call.1
= control target key start
LH: loop header
LB: loop body
LE: loop exit
PB: predicated region body
PF: predicated region fallthrough
CT: control target
= control target key end

     0   :  { %10 = vsyncpa [#allocation3], 0  ;;  %s6202_s0 = inlined_call_operand.vmem [shape: bf16[2,18,18,4], index: 0, kind: input, shape index: {}]   ;;  %s6203_s1 = inlined_call_operand.vmem [shape: bf16[3,3,4,128], index: 1, kind: input, shape index: {}]   ;;  %s6204_s2 = inlined_call_operand.hbm [shape: bf16[2,128,256], index: 2, kind: output, shape index: {0}]   ;;  %s6205_s3 = inlined_call_operand.hbm [shape: f32[1,128], index: 3, kind: output, shape index: {1}]   ;;  %s6206_s4 = inlined_call_operand.hbm [shape: f32[1,128], index: 4, kind: output, shape index: {2}]  }
   0x1   :  { %12 = vsyncpa [#allocation3 + $0x1], 0 }
   0x2   :  { %13 = vsyncpa [#allocation5], 0  ;;  %s4510_s15 = smov 0   ;;  %s4512_s16 = smov 0  }
   0x3   :  { %s4514_s17 = smov 0   ;;  %s4516_s18 = smov 0  }
   0x4   :  { %s4518_s19 = smov 0   ;;  %s4520_s20 = smov 0  }
   0x5 LB: > { %s3400_s21 = sadd.s32 4294967295, %s4477_s20   ;;  %s3401_s22 = sadd.s32 4294967294, %s4477_s20   ;;  %s4477_s20 = sphi %s4520_s20, %s19_s20   ;;  %s4473_s19 = sphi %s4518_s19, %s6332_s19   ;;  %s4469_s18 = sphi %s4516_s18, %s6331_s18   ;;  %s4465_s17 = sphi %s4514_s17, %s6330_s17   ;;  %s4461_s16 = sphi %s4512_s16, %s6329_s16   ;;  %s4457_s15 = sphi %s4510_s15, %s6328_s15  }
   0x6   : > { %s28_s23 = sadd.s32 1, %s4473_s19  ;;  %s92_s24 = sadd.s32 1, %s4465_s17 }
   0x7   : > { %p29_p0 = scmp.ge.s32.totalorder %s28_s23, 2  ;;  %p102_p1 = scmp.ne.s32.totalorder %s4465_s17, %s4461_s16 }
   0x8   : > { %p4546_p2 = scmp.eq.s32.totalorder %s3400_s21, 1  ;;  %p108_p3 = scmp.ne.s32.totalorder %s4461_s16, %s4457_s15 }
   0x9   : > { %s6334_s23 = smov (%p29_p0, %s28_s23), 0  ;;  %p109_p5 = scmp.eq.s32.totalorder %s3401_s22, 1 }
   0xa   : > { %p4556_p4 = por %p4546_p2, %p102_p1  ;;  %s87_s27 = ssub.s32 %s4473_s19, %s6334_s23 }
   0xb   : > { %p3405_p6 = scmp.ge.s32.totalorder %s4477_s20, 1  ;;  %p90_p7 = scmp.eq.s32.totalorder %s87_s27, 0 }
   0xc   : > { %p4563_p8 = por %p109_p5, %p108_p3  ;;  %p194_p9 = scmp.lt.s32.totalorder %s4477_s20, 3 }
   0xd   : > { %s4569_s29 = scalar_select %p90_p7, %s4465_s17, %s92_s24  }
   0xe   : > { %p195_p10 = pnand %p3405_p6, %p194_p9 }
  0x10   : > { %198 = sbr.rel (%p195_p10) target bundleno = 770 (0x302), region = 28 }
  0x15   : > { %v3408_v0 = vld [vmem:[%s6203_s1 + $0x2] sm:$0x3]  ;;  %vm776_vm0 = vcmask 1041408   ;;  %s217_s6 = sand.u32 1, %s4461_s16   ;;  %p224_p11 = scmp.lt.s32.totalorder %s4469_s18, 1  ;;  %vm727_vm3 = vcmask 31744  }
  0x16   : > { %4137 = vmatprep.subr.msk.bf16.mxu1 %vm776_vm0, %v3408_v0  ;;  %s4579_s7 = sshll.u32 %s217_s6, 7  ;;  %4136 = vmatprep.subr.msk.bf16.mxu0 %vm776_vm0, %v3408_v0  ;;  %v778_v1 = vsel %vm776_vm0, %v3408_v0, 0  ;;  %v289_v2 = vld [vmem:[%s6203_s1] sm:$0x3]  ;;  %v3489_v3 = vld [vmem:[%s6203_s1 + $0x4] sm:$0x3] }
  0x17   : > { %4135 = vmatpush3.bf16.msra.mxu1 %v778_v1  ;;  %3829 = vmatpush3.bf16.msra.mxu0 %v778_v1  ;;  %s225_s12 = scalar_select %p224_p11, %s4469_s18, 1  ;;  %vm290_vm1 = vsmask.f32 3328  ;;  %vm291_vm2 = vsmask.f32 7440  ;;  %v4598_v4 = vsel %vm776_vm0, %v289_v2, 0 }
  0x18   : > { %4138 = vmatprep.subr.msk.bf16.mxu1 %vm776_vm0, %v289_v2  ;;  %4139 = vmatprep.subr.msk.bf16.mxu0 %vm776_vm0, %v3489_v3  ;;  %v4601_v5 = vsel %vm776_vm0, %v3489_v3, 0  ;;  %vm4640_vm4 = vmor %vm290_vm1, %vm291_vm2  ;;  %v6253_v32 = vmov 0  ;;  %vm1249_vm5 = vcmask 1042432   ;;  %vm1250_vm6 = vcmask 1046532   ;;  %p3632_p12 = scmp.ne.s32.totalorder %s4469_s18, 0 }
  0x19   : > { %s4146_s13 = smul.u32 216, %s225_s12  ;;  %v6254_v32 = vsel %vm4640_vm4, 4294967295, %v6253_v32  ;;  %vm4963_vm7 = vmor %vm1249_vm5, %vm1250_vm6 }
  0x1a   : > { %6255 = vst [vmem:[#allocation9_spill] sm:$0xff] %v6254_v32 }
  0x1b   : > { %s4595_s22 = scalar_lea.vmem %s6202_s0, %s4146_s13 }
  0x1c   : > { %v4604_v6 = vld [vmem:[%s4595_s22] sm:$0xf]  ;;  %v4607_v7 = vld [vmem:[%s4595_s22 + $0x4] sm:$0xf]  ;;  %v4610_v8 = vld [vmem:[%s4595_s22 + $0x8] sm:$0x1] }
  0x1d   : > { %v294_v9 = vshrl.u32 %v4604_v6, 16  ;;  %v297_v10 = vshll.u32 %v4604_v6, 16  ;;  %v303_v11 = vshll.u32 %v4607_v7, 16  ;;  %v307_v12 = vshrl.u32 %v4607_v7, 16  ;;  %v4617_v13 = vld [vmem:[%s4595_s22 + $0x60] sm:$0xf] }
  0x1e   : > { %v313_v14 = vshll.u32 %v4610_v8, 16  ;;  %v4622_v16 = vld [vmem:[%s4595_s22 + $0x64] sm:$0xf]  ;;  %v4625_v17 = vld [vmem:[%s4595_s22 + $0x68] sm:$0x1]  ;;  %v486_v23 = vshrl.u32 %v4617_v13, 16 }
  0x1f   : > { %v296_v18 = vrot.slane %v294_v9, 4  ;;  %v299_v19 = vrot.slane %v297_v10, 5  ;;  %v305_v20 = vrot.slane %v303_v11, 5  ;;  %v309_v21 = vrot.slane %v307_v12, 4  ;;  %v4633_v30 = vld [vmem:[%s4595_s22 + $0xc] sm:$0xf] }
  0x20   : > { %v315_v22 = vrot.slane %v313_v14, 5  ;;  %v489_v24 = vshll.u32 %v4617_v13, 16  ;;  %v495_v25 = vshll.u32 %v4622_v16, 16  ;;  %v499_v28 = vshrl.u32 %v4622_v16, 16  ;;  %v4636_v31 = vld [vmem:[%s4595_s22 + $0x10] sm:$0xf] }
  0x21   : > { %v300_v26 = vor.u32 %v299_v19, %v296_v18  ;;  %v310_v27 = vor.u32 %v309_v21, %v305_v20  ;;  %v505_v29 = vshll.u32 %v4625_v17, 16  ;;  %v488_v33 = vrot.slane %v486_v23, 4  ;;  %v4647_v42 = vld [vmem:[%s4595_s22 + $0x14] sm:$0x1]  ;;  %v4658_v54 = vld [vmem:[%s4595_s22 + $0x6c] sm:$0xf] }
  0x22   : > { %v491_v34 = vrot.slane %v489_v24, 5  ;;  %v497_v35 = vrot.slane %v495_v25, 5  ;;  %v501_v39 = vrot.slane %v499_v28, 4  ;;  %v318_v43 = vshrl.u32 %v4633_v30, 16  ;;  %6256 = vst [vmem:[#allocation10_spill] sm:$0xff] %v4658_v54 }
  0x23   : > { %v301_v37 = vrot.slane %v300_v26, 4  ;;  %v311_v38 = vrot.slane %v310_v27, 4  ;;  %v507_v40 = vrot.slane %v505_v29, 5  ;;  %v321_v44 = vshll.u32 %v4633_v30, 16  ;;  %v4662_v59 = vld [vmem:[%s4595_s22 + $0x70] sm:$0xf] }
  0x24   : > { %v492_v41 = vor.u32 %v491_v34, %v488_v33  ;;  %v327_v45 = vshll.u32 %v4636_v31, 16  ;;  %v502_v48 = vor.u32 %v501_v39, %v497_v35  ;;  %v331_v49 = vshrl.u32 %v4636_v31, 16  ;;  %v4670_v0 = vld [vmem:[%s4595_s22 + $0x74] sm:$0x1]  ;;  %v4676_v10 = vld [vmem:[%s4595_s22 + $0x18] sm:$0xf] }
  0x25   : > { %v306_v46 = vsel %vm4640_vm4, %v301_v37, %v305_v20  ;;  %v316_v47 = vsel %vm4640_vm4, %v311_v38, %v315_v22  ;;  %v320_v52 = vrot.slane %v318_v43, 4  ;;  %v323_v53 = vrot.slane %v321_v44, 5  ;;  %6257 = vst [vmem:[#allocation11_spill] sm:$0xff] %v4670_v0  ;;  %v4685_v23 = vld [vmem:[%s4595_s22 + $0x1c] sm:$0xf] }
  0x26   : > { %v3409_v50 = vcombine.low %v306_v46, %v316_v47  ;;  %v493_v51 = vrot.slane %v492_v41, 4  ;;  %v503_v55 = vrot.slane %v502_v48, 4  ;;  %v329_v56 = vrot.slane %v327_v45, 5  ;;  %v4692_v27 = vld [vmem:[%s4595_s22 + $0x20] sm:$0x1] }
  0x27   : > { %v333_v57 = vrot.slane %v331_v49, 4  ;;  %v337_v58 = vshll.u32 %v4647_v42, 16  ;;  %v324_v61 = vor.u32 %v323_v53, %v320_v52  ;;  %v510_v9 = vshrl.u32 %v4658_v54, 16  ;;  %v4699_v37 = vld [vmem:[%s4595_s22 + $0x78] sm:$0xf] }
  0x28   : > { %3830 = vmatprep.mubr.msk.bf16.mxu0 %vm727_vm3, %v3409_v50  ;;  %v498_v60 = vsel %vm4640_vm4, %v493_v51, %v497_v35  ;;  %v508_v1 = vsel %vm4640_vm4, %v503_v55, %v507_v40  ;;  %v513_v14 = vshll.u32 %v4658_v54, 16  ;;  %v519_v18 = vshll.u32 %v4662_v59, 16  ;;  %6259 = vst [vmem:[#allocation13_spill] sm:$0xff] %v4699_v37  ;;  %v4707_v43 = vld [vmem:[%s6203_s1 + $0x8] sm:$0x3] }
  0x29   : > { %v334_v2 = vor.u32 %v333_v57, %v329_v56  ;;  %v339_v3 = vrot.slane %v337_v58, 5  ;;  %v4678_v11 = vcombine.low %v498_v60, %v508_v1  ;;  %v325_v12 = vrot.slane %v324_v61, 4  ;;  %v4712_v48 = vld [vmem:[%s4595_s22 + $0x7c] sm:$0xf]  ;;  %v4720_v58 = vld [vmem:[%s4595_s22 + $0x80] sm:$0x1] }
  0x2a   : > { %v512_v20 = vrot.slane %v510_v9, 4  ;;  %v523_v21 = vshrl.u32 %v4662_v59, 16  ;;  %v529_v22 = vshll.u32 %v4670_v0, 16  ;;  %v515_v25 = vrot.slane %v513_v14, 5  ;;  %6261 = vst [vmem:[#allocation15_spill] sm:$0xff] %v4712_v48  ;;  %6262 = vst [vmem:[#allocation16_spill] sm:$0xff] %v4720_v58 }
  0x2b   : > { %6258 = vst [vmem:[#allocation12_spill] sm:$0xff] %v4678_v11  ;;  %v335_v19 = vrot.slane %v334_v2, 4  ;;  %3846 = vmatprep.mubr.msk.bf16.mxu1 %vm727_vm3, %v4678_v11  ;;  %v330_v24 = vsel %vm4640_vm4, %v325_v12, %v329_v56  ;;  %v521_v26 = vrot.slane %v519_v18, 5  ;;  %v342_v28 = vshrl.u32 %v4676_v10, 16  ;;  %v4734_v18 = vld [vmem:[%s4595_s22 + $0x28] sm:$0xf] }
  0x2c   : > { %v525_v33 = vrot.slane %v523_v21, 4  ;;  %v531_v34 = vrot.slane %v529_v22, 5  ;;  %v345_v35 = vshll.u32 %v4676_v10, 16  ;;  %v516_v39 = vor.u32 %v515_v25, %v512_v20 }
  0x2d   : > { %v340_v29 = vsel %vm4640_vm4, %v335_v19, %v339_v3  ;;  %v344_v40 = vrot.slane %v342_v28, 4  ;;  %v351_v41 = vshll.u32 %v4685_v23, 16  ;;  %v355_v46 = vshrl.u32 %v4685_v23, 16  ;;  %v4726_v3 = vld [vmem:[%s4595_s22 + $0x24] sm:$0xf] }
  0x2e   : > { %v4701_v38 = vcombine.low %v330_v24, %v340_v29  ;;  %v526_v44 = vor.u32 %v525_v33, %v521_v26  ;;  %v347_v45 = vrot.slane %v345_v35, 5  ;;  %v361_v47 = vshll.u32 %v4692_v27, 16  ;;  %v4742_v24 = vld [vmem:[%s6203_s1 + $0x6] sm:$0x3]  ;;  %v4747_v29 = vld [vmem:[%s4595_s22 + $0x2c] sm:$0x1] }
  0x2f   : > { %v517_v49 = vrot.slane %v516_v39, 4  ;;  %v353_v50 = vrot.slane %v351_v41, 5  ;;  %v534_v51 = vshrl.u32 %v4699_v37, 16  ;;  %v537_v52 = vshll.u32 %v4699_v37, 16  ;;  %v4755_v41 = vld [vmem:[%s4595_s22 + $0x84] sm:$0xf] }
  0x30   : > { %6260 = vst [vmem:[#allocation14_spill] sm:$0xff] %v4701_v38  ;;  %3831 = vmatmul.mubr.msk.bf16.vlgmr.msra.gmra.mxu0 %vm727_vm3, %v4701_v38  ;;  %v527_v53 = vrot.slane %v526_v44, 4  ;;  %v348_v55 = vor.u32 %v347_v45, %v344_v40  ;;  %v357_v56 = vrot.slane %v355_v46, 4  ;;  %v363_v57 = vrot.slane %v361_v47, 5  ;;  %v4902_v38 = vld [vmem:[%s4595_s22 + $0xb0] sm:$0x1] }
  0x31   : > { %3897 = vmatpush3.bf16.msra.mxu0 %v4601_v5  ;;  %v522_v60 = vsel %vm4640_vm4, %v517_v49, %v521_v26  ;;  %v536_v61 = vrot.slane %v534_v51, 4  ;;  %v539_v1 = vrot.slane %v537_v52, 5  ;;  %v543_v2 = vshll.u32 %v4712_v48, 16  ;;  %v4762_v49 = vld [vmem:[%s4595_s22 + $0x88] sm:$0xf]  ;;  %6274 = vst [vmem:[#allocation28_spill] sm:$0xff] %v4902_v38 }
  0x32   : > { %4141 = vmatprep.subr.msk.bf16.mxu0 %vm776_vm0, %v4707_v43  ;;  %v532_v5 = vsel %vm4640_vm4, %v527_v53, %v531_v34  ;;  %v349_v9 = vrot.slane %v348_v55, 4  ;;  %v358_v12 = vor.u32 %v357_v56, %v353_v50  ;;  %v547_v14 = vshrl.u32 %v4712_v48, 16  ;;  %v4924_v48 = vld [vmem:[%s4595_s22 + $0x5c] sm:$0x1] }
  0x33   : > { %v4736_v19 = vcombine.low %v522_v60, %v532_v5  ;;  %v540_v20 = vor.u32 %v539_v1, %v536_v61  ;;  %v545_v21 = vrot.slane %v543_v2, 5  ;;  %v553_v22 = vshll.u32 %v4720_v58, 16 }
  0x34   : > { %v354_v25 = vsel %vm4640_vm4, %v349_v9, %v353_v50  ;;  %v359_v26 = vrot.slane %v358_v12, 4  ;;  %v549_v28 = vrot.slane %v547_v14, 4  ;;  %v366_v33 = vshrl.u32 %v4726_v3, 16  ;;  %v4781_v9 = vld [vmem:[%s4595_s22 + $0x30] sm:$0xf] }
  0x35   : > { %6263 = vst [vmem:[#allocation17_spill] sm:$0xff] %v4736_v19  ;;  %3847 = vmatmul.mubr.msk.bf16.vlgmr.msra.gmra.mxu1 %vm727_vm3, %v4736_v19  ;;  %v541_v34 = vrot.slane %v540_v20, 4  ;;  %v555_v35 = vrot.slane %v553_v22, 5  ;;  %v369_v39 = vshll.u32 %v4726_v3, 16  ;;  %v375_v40 = vshll.u32 %v4734_v18, 16 }
  0x36   : > { %3863 = vmatpush3.bf16.msra.mxu1 %v4598_v4  ;;  %v364_v44 = vsel %vm4640_vm4, %v359_v26, %v363_v57  ;;  %v550_v45 = vor.u32 %v549_v28, %v545_v21  ;;  %v368_v46 = vrot.slane %v366_v33, 4  ;;  %v379_v47 = vshrl.u32 %v4734_v18, 16  ;;  %v4772_v57 = vld [vmem:[%s4595_s22 + $0x8c] sm:$0x1]  ;;  %v4786_v22 = vld [vmem:[%s4595_s22 + $0x34] sm:$0xf] }
  0x37   : > { %v4764_v50 = vcombine.low %v354_v25, %v364_v44  ;;  %v546_v51 = vsel %vm4640_vm4, %v541_v34, %v545_v21  ;;  %v371_v52 = vrot.slane %v369_v39, 5  ;;  %v377_v53 = vrot.slane %v375_v40, 5  ;;  %4140 = vmatprep.subr.msk.bf16.mxu1 %vm776_vm0, %v4742_v24 }
  0x38   : > { %v551_v4 = vrot.slane %v550_v45, 4  ;;  %v381_v55 = vrot.slane %v379_v47, 4  ;;  %v385_v56 = vshll.u32 %v4747_v29, 16  ;;  %v558_v60 = vshrl.u32 %v4755_v41, 16 }
  0x39   : > { %6264 = vst [vmem:[#allocation18_spill] sm:$0xff] %v4764_v50  ;;  %3834 = vmatprep.mubr.msk.bf16.mxu0 %vm727_vm3, %v4764_v50  ;;  %v372_v61 = vor.u32 %v371_v52, %v368_v46  ;;  %v561_v1 = vshll.u32 %v4755_v41, 16  ;;  %v567_v2 = vshll.u32 %v4762_v49, 16  ;;  %v571_v5 = vshrl.u32 %v4762_v49, 16  ;;  %v4797_v46 = vld [vmem:[%s4595_s22 + $0x38] sm:$0x1] }
  0x3a   : > { %v556_v12 = vsel %vm4640_vm4, %v551_v4, %v555_v35  ;;  %v382_v14 = vor.u32 %v381_v55, %v377_v53  ;;  %v387_v20 = vrot.slane %v385_v56, 5  ;;  %v560_v21 = vrot.slane %v558_v60, 4  ;;  %v4802_v52 = vld [vmem:[%s4595_s22 + $0x90] sm:$0xf] }
  0x3b   : > { %v4788_v25 = vcombine.low %v546_v51, %v556_v12  ;;  %v373_v26 = vrot.slane %v372_v61, 4  ;;  %v563_v28 = vrot.slane %v561_v1, 5  ;;  %v569_v33 = vrot.slane %v567_v2, 5  ;;  %v4807_v61 = vld [vmem:[%s4595_s22 + $0x94] sm:$0xf] }
  0x3c   : > { %v383_v34 = vrot.slane %v382_v14, 4  ;;  %v573_v39 = vrot.slane %v571_v5, 4  ;;  %v577_v40 = vshll.u32 %v4772_v57, 16  ;;  %v390_v44 = vshrl.u32 %v4781_v9, 16 }
  0x3d   : > { %6265 = vst [vmem:[#allocation19_spill] sm:$0xff] %v4788_v25  ;;  %3850 = vmatprep.mubr.msk.bf16.mxu1 %vm727_vm3, %v4788_v25  ;;  %v378_v35 = vsel %vm4640_vm4, %v373_v26, %v377_v53  ;;  %v564_v45 = vor.u32 %v563_v28, %v560_v21  ;;  %v393_v47 = vshll.u32 %v4781_v9, 16  ;;  %v399_v51 = vshll.u32 %v4786_v22, 16  ;;  %v4853_v25 = vld [vmem:[%s4595_s22 + $0xa0] sm:$0xf] }
  0x3e   : > { %v388_v4 = vsel %vm4640_vm4, %v383_v34, %v387_v20  ;;  %v574_v55 = vor.u32 %v573_v39, %v569_v33  ;;  %v579_v56 = vrot.slane %v577_v40, 5  ;;  %v392_v60 = vrot.slane %v390_v44, 4  ;;  %v4819_v34 = vld [vmem:[%s4595_s22 + $0x98] sm:$0x1]  ;;  %v4824_v44 = vld [vmem:[%s4595_s22 + $0x3c] sm:$0xf] }
  0x3f   : > { %v4809_v53 = vcombine.low %v378_v35, %v388_v4  ;;  %v565_v1 = vrot.slane %v564_v45, 4  ;;  %v395_v2 = vrot.slane %v393_v47, 5  ;;  %v401_v5 = vrot.slane %v399_v51, 5  ;;  %v4829_v4 = vld [vmem:[%s4595_s22 + $0x40] sm:$0xf] }
  0x40   : > { %v575_v12 = vrot.slane %v574_v55, 4  ;;  %v403_v14 = vshrl.u32 %v4786_v22, 16  ;;  %v409_v21 = vshll.u32 %v4797_v46, 16  ;;  %v582_v20 = vshrl.u32 %v4802_v52, 16 }
  0x41   : > { %6266 = vst [vmem:[#allocation20_spill] sm:$0xff] %v4809_v53  ;;  %3835 = vmatmul.mubr.msk.bf16.gmra.mxu0 %vm727_vm3, %v4809_v53  ;;  %v570_v26 = vsel %vm4640_vm4, %v565_v1, %v569_v33  ;;  %v396_v28 = vor.u32 %v395_v2, %v392_v60  ;;  %v585_v39 = vshll.u32 %v4802_v52, 16  ;;  %v591_v40 = vshll.u32 %v4807_v61, 16 }
  0x42   : > { %v580_v35 = vsel %vm4640_vm4, %v575_v12, %v579_v56  ;;  %v405_v45 = vrot.slane %v403_v14, 4  ;;  %v411_v47 = vrot.slane %v409_v21, 5  ;;  %v584_v51 = vrot.slane %v582_v20, 4  ;;  %v4841_v14 = vld [vmem:[%s4595_s22 + $0x44] sm:$0x1] }
  0x43   : > { %v4831_v33 = vcombine.low %v570_v26, %v580_v35  ;;  %v397_v55 = vrot.slane %v396_v28, 4  ;;  %v587_v60 = vrot.slane %v585_v39, 5  ;;  %v593_v1 = vrot.slane %v591_v40, 5  ;;  %v4846_v26 = vld [vmem:[%s4595_s22 + $0x9c] sm:$0xf] }
  0x44   : > { %v406_v2 = vor.u32 %v405_v45, %v401_v5  ;;  %v595_v36 = vshrl.u32 %v4807_v61, 16  ;;  %v601_v63 = vshll.u32 %v4819_v34, 16  ;;  %v414_v15 = vshrl.u32 %v4824_v44, 16 }
  0x45   : > { %6267 = vst [vmem:[#allocation21_spill] sm:$0xff] %v4831_v33  ;;  %3851 = vmatmul.mubr.msk.bf16.gmra.mxu1 %vm727_vm3, %v4831_v33  ;;  %v402_v56 = vsel %vm4640_vm4, %v397_v55, %v401_v5  ;;  %v588_v12 = vor.u32 %v587_v60, %v584_v51  ;;  %v417_v21 = vshll.u32 %v4824_v44, 16  ;;  %v423_v20 = vshll.u32 %v4829_v4, 16 }
  0x46   : > { %v407_v28 = vrot.slane %v406_v2, 4  ;;  %v597_v39 = vrot.slane %v595_v36, 4  ;;  %v603_v40 = vrot.slane %v601_v63, 5  ;;  %v416_v35 = vrot.slane %v414_v15, 4 }
  0x47   : > { %v589_v45 = vrot.slane %v588_v12, 4  ;;  %v419_v62 = vrot.slane %v417_v21, 5  ;;  %v425_v33 = vrot.slane %v423_v20, 5  ;;  %v427_v5 = vshrl.u32 %v4829_v4, 16  ;;  %v4861_v21 = vld [vmem:[%s4595_s22 + $0xa4] sm:$0x1] }
  0x48   : > { %v412_v51 = vsel %vm4640_vm4, %v407_v28, %v411_v47  ;;  %v598_v55 = vor.u32 %v597_v39, %v593_v1  ;;  %v433_v60 = vshll.u32 %v4841_v14, 16  ;;  %v606_v2 = vshrl.u32 %v4846_v26, 16  ;;  %6269 = vst [vmem:[#allocation23_spill] sm:$0xff] %v4861_v21  ;;  %v4864_v20 = vld [vmem:[%s4595_s22 + $0x48] sm:$0xf] }
  0x49   : > { %v4856_v36 = vcombine.low %v402_v56, %v412_v51  ;;  %v594_v15 = vsel %vm4640_vm4, %v589_v45, %v593_v1  ;;  %v420_v63 = vor.u32 %v419_v62, %v416_v35  ;;  %v429_v12 = vrot.slane %v427_v5, 4 }
  0x4a   : > { %v599_v47 = vrot.slane %v598_v55, 4  ;;  %v435_v28 = vrot.slane %v433_v60, 5  ;;  %v608_v39 = vrot.slane %v606_v2, 4  ;;  %v609_v19 = vshll.u32 %v4846_v26, 16  ;;  %v4875_v55 = vld [vmem:[%s4595_s22 + $0x4c] sm:$0xf] }
  0x4b   : > { %6268 = vst [vmem:[#allocation22_spill] sm:$0xff] %v4856_v36  ;;  %3838 = vmatprep.mubr.msk.bf16.mxu0 %vm727_vm3, %v4856_v36  ;;  %v421_v56 = vrot.slane %v420_v63, 4  ;;  %v430_v51 = vor.u32 %v429_v12, %v425_v33  ;;  %v615_v1 = vshll.u32 %v4853_v25, 16  ;;  %v619_v62 = vshrl.u32 %v4853_v25, 16  ;;  %v4883_v36 = vld [vmem:[%s4595_s22 + $0x50] sm:$0x1] }
  0x4c   : > { %v604_v35 = vsel %vm4640_vm4, %v599_v47, %v603_v40  ;;  %v611_v45 = vrot.slane %v609_v19, 5  ;;  %v625_v5 = vshll.u32 %v4861_v21, 16  ;;  %v438_v60 = vshrl.u32 %v4864_v20, 16  ;;  %v4886_v47 = vld [vmem:[%s4595_s22 + $0xa8] sm:$0xf] }
  0x4d   : > { %v4878_v2 = vcombine.low %v594_v15, %v604_v35  ;;  %v426_v63 = vsel %vm4640_vm4, %v421_v56, %v425_v33  ;;  %v431_v12 = vrot.slane %v430_v51, 4  ;;  %v617_v11 = vrot.slane %v615_v1, 5  ;;  %6271 = vst [vmem:[#allocation25_spill] sm:$0xff] %v4886_v47 }
  0x4e   : > { %v612_v53 = vor.u32 %v611_v45, %v608_v39  ;;  %v621_v50 = vrot.slane %v619_v62, 4  ;;  %v627_v40 = vrot.slane %v625_v5, 5  ;;  %v440_v19 = vrot.slane %v438_v60, 4  ;;  %v4899_v45 = vld [vmem:[%s4595_s22 + $0xac] sm:$0xf] }
  0x4f   : > { %6270 = vst [vmem:[#allocation24_spill] sm:$0xff] %v4878_v2  ;;  %3854 = vmatprep.mubr.msk.bf16.mxu1 %vm727_vm3, %v4878_v2  ;;  %v436_v15 = vsel %vm4640_vm4, %v431_v12, %v435_v28  ;;  %v441_v33 = vshll.u32 %v4864_v20, 16  ;;  %v447_v56 = vshll.u32 %v4875_v55, 16  ;;  %v451_v51 = vshrl.u32 %v4875_v55, 16  ;;  %6273 = vst [vmem:[#allocation27_spill] sm:$0xff] %v4899_v45 }
  0x50   : > { %v4895_v1 = vcombine.low %v426_v63, %v436_v15  ;;  %v613_v39 = vrot.slane %v612_v53, 4  ;;  %v622_v62 = vor.u32 %v621_v50, %v617_v11  ;;  %v457_v35 = vshll.u32 %v4883_v36, 16 }
  0x51   : > { %v443_v5 = vrot.slane %v441_v33, 5  ;;  %v449_v60 = vrot.slane %v447_v56, 5  ;;  %v453_v2 = vrot.slane %v451_v51, 4  ;;  %v630_v28 = vshrl.u32 %v4886_v47, 16  ;;  %v4912_v51 = vld [vmem:[%s4595_s22 + $0x54] sm:$0xf] }
  0x52   : > { %6272 = vst [vmem:[#allocation26_spill] sm:$0xff] %v4895_v1  ;;  %3839 = vmatmul.mubr.msk.bf16.gmra.mxu0 %vm727_vm3, %v4895_v1  ;;  %v618_v53 = vsel %vm4640_vm4, %v613_v39, %v617_v11  ;;  %v623_v50 = vrot.slane %v622_v62, 4  ;;  %v459_v63 = vrot.slane %v457_v35, 5  ;;  %v633_v12 = vshll.u32 %v4886_v47, 16  ;;  %v4919_v62 = vld [vmem:[%s4595_s22 + $0x58] sm:$0xf] }
  0x53   : > { %v444_v15 = vor.u32 %v443_v5, %v440_v19  ;;  %v454_v58 = vor.u32 %v453_v2, %v449_v60  ;;  %v632_v33 = vrot.slane %v630_v28, 4  ;;  %v639_v56 = vshll.u32 %v4899_v45, 16 }
  0x54   : > { %v628_v1 = vsel %vm4640_vm4, %v623_v50, %v627_v40  ;;  %v635_v37 = vrot.slane %v633_v12, 5  ;;  %v643_v11 = vshrl.u32 %v4899_v45, 16  ;;  %v649_v39 = vshll.u32 %v4902_v38, 16 }
  0x55   : > { %v4921_v2 = vcombine.low %v618_v53, %v628_v1  ;;  %v445_v19 = vrot.slane %v444_v15, 4  ;;  %v455_v35 = vrot.slane %v454_v58, 4  ;;  %v641_v5 = vrot.slane %v639_v56, 5 }
  0x56   : > { %v636_v28 = vor.u32 %v635_v37, %v632_v33  ;;  %v645_v0 = vrot.slane %v643_v11, 4  ;;  %v651_v54 = vrot.slane %v649_v39, 5  ;;  %v462_v40 = vshrl.u32 %v4912_v51, 16  ;;  %v4936_v37 = vld [vmem:[%s4595_s22 + $0xb4] sm:$0xf] }
  0x57   : > { %6275 = vst [vmem:[#allocation29_spill] sm:$0xff] %v4921_v2  ;;  %3855 = vmatmul.mubr.msk.bf16.gmra.mxu1 %vm727_vm3, %v4921_v2  ;;  %v450_v50 = vsel %vm4640_vm4, %v445_v19, %v449_v60  ;;  %v460_v1 = vsel %vm4640_vm4, %v455_v35, %v459_v63  ;;  %v465_v58 = vshll.u32 %v4912_v51, 16  ;;  %v471_v53 = vshll.u32 %v4919_v62, 16  ;;  %6276 = vst [vmem:[#allocation30_spill] sm:$0xff] %v4936_v37  ;;  %v4941_v11 = vld [vmem:[%s4595_s22 + $0xb8] sm:$0xf] }
  0x58   : > { %v4938_v12 = vcombine.low %v450_v50, %v460_v1  ;;  %v637_v15 = vrot.slane %v636_v28, 4  ;;  %v646_v33 = vor.u32 %v645_v0, %v641_v5  ;;  %v464_v56 = vrot.slane %v462_v40, 4 }
  0x59   : > { %v467_v39 = vrot.slane %v465_v58, 5  ;;  %v473_v2 = vrot.slane %v471_v53, 5  ;;  %v475_v60 = vshrl.u32 %v4919_v62, 16  ;;  %v481_v63 = vshll.u32 %v4924_v48, 16  ;;  %v4952_v58 = vld [vmem:[%s4595_s22 + $0xbc] sm:$0x1] }
  0x5a   : > { %6277 = vst [vmem:[#allocation31_spill] sm:$0xff] %v4938_v12  ;;  %3842 = vmatprep.mubr.msk.bf16.mxu0 %vm727_vm3, %v4938_v12  ;;  %v642_v19 = vsel %vm4640_vm4, %v637_v15, %v641_v5  ;;  %v647_v35 = vrot.slane %v646_v33, 4  ;;  %v654_v28 = vshrl.u32 %v4936_v37, 16  ;;  %v657_v0 = vshll.u32 %v4936_v37, 16 }
  0x5b   : > { %v468_v40 = vor.u32 %v467_v39, %v464_v56  ;;  %v477_v50 = vrot.slane %v475_v60, 4  ;;  %v483_v1 = vrot.slane %v481_v63, 5  ;;  %v663_v53 = vshll.u32 %v4941_v11, 16 }
  0x5c   : > { %v652_v38 = vsel %vm4640_vm4, %v647_v35, %v651_v54  ;;  %v656_v47 = vrot.slane %v654_v28, 4  ;;  %v659_v12 = vrot.slane %v657_v0, 5  ;;  %v667_v45 = vshrl.u32 %v4941_v11, 16 }
  0x5d   : > { %v4958_v5 = vcombine.low %v642_v19, %v652_v38  ;;  %v469_v15 = vrot.slane %v468_v40, 4  ;;  %v478_v33 = vor.u32 %v477_v50, %v473_v2  ;;  %v665_v21 = vrot.slane %v663_v53, 5 }
  0x5e   : > { %v660_v37 = vor.u32 %v659_v12, %v656_v47  ;;  %v669_v56 = vrot.slane %v667_v45, 4  ;;  %v673_v39 = vshll.u32 %v4952_v58, 16  ;;  %v3473_v54 = vrot.slane %v4604_v6, 9 }
  0x5f   : > { %3858 = vmatprep.mubr.msk.bf16.mxu1 %vm727_vm3, %v4958_v5  ;;  %v474_v38 = vsel %vm4640_vm4, %v469_v15, %v473_v2  ;;  %v479_v63 = vrot.slane %v478_v33, 4  ;;  %v1254_v47 = vrot.slane %v4607_v7, 5  ;;  %v4975_v45 = vcombine.low %v4633_v30, %v4636_v31 }
  0x60   : > { %v661_v12 = vrot.slane %v660_v37, 4  ;;  %v670_v19 = vor.u32 %v669_v56, %v665_v21  ;;  %v675_v35 = vrot.slane %v673_v39, 5  ;;  %v3474_v28 = vrot.slane %v4633_v30, 9 }
  0x61   : > { %v484_v0 = vsel %vm4640_vm4, %v479_v63, %v483_v1  ;;  %v1255_v40 = vsel %vm4963_vm7, %v3473_v54, %v1254_v47  ;;  %v1256_v50 = vrot.slane %v1254_v47, 4  ;;  %v6280_v2 = vrot.slane %v4636_v31, 5 }
  0x62   : > { %v4984_v15 = vcombine.low %v474_v38, %v484_v0  ;;  %v666_v33 = vsel %vm4640_vm4, %v661_v12, %v665_v21  ;;  %v671_v37 = vrot.slane %v670_v19, 4  ;;  %v6282_v1 = vrot.slane %v4610_v8, 5 }
  0x63   : > { %v1263_v53 = vrot.slane %v6280_v2, 4  ;;  %v6281_v56 = vmov %v6280_v2  ;;  %v6283_v54 = vrot.slane %v4647_v42, 5  ;;  %v5002_v63 = vcombine.low %v4676_v10, %v4685_v23 }
  0x64   : > { %v1262_v30 = vsel %vm4963_vm7, %v3474_v28, %v6281_v56  ;;  %v1258_v39 = vsel %vm4963_vm7, %v1256_v50, %v6282_v1  ;;  %v3475_v21 = vrot.slane %v4676_v10, 9  ;;  %3843 = vmatmul.mubr.msk.bf16.gmra.mxu0 %vm727_vm3, %v4984_v15  ;;  %v676_v8 = vsel %vm4640_vm4, %v671_v37, %v675_v35 }
  0x65   : > { %v1265_v38 = vsel %vm4963_vm7, %v1263_v53, %v6283_v54  ;;  %v3490_v31 = vcombine.low %v1255_v40, %v1258_v39  ;;  %v1268_v42 = vrot.slane %v4685_v23, 5  ;;  %v5012_v12 = vcombine.low %v666_v33, %v676_v8 }
  0x66   : > { %v5009_v47 = vcombine.low %v1262_v30, %v1265_v38  ;;  %v1271_v19 = vrot.slane %v4692_v27, 5  ;;  %v1275_v0 = vrot.slane %v4734_v18, 5  ;;  %v3476_v35 = vrot.slane %v4726_v3, 9 }
  0x67   : > { %6284 = vst [vmem:[#allocation32_spill] sm:$0xff] %v5012_v12  ;;  %3898 = vmatprep.mubr.msk.bf16.mxu0 %vm727_vm3, %v3490_v31  ;;  %v1269_v10 = vsel %vm4963_vm7, %v3475_v21, %v1268_v42  ;;  %v1270_v28 = vrot.slane %v1268_v42, 4  ;;  %3859 = vmatmul.mubr.msk.bf16.gmra.mxu1 %vm727_vm3, %v5012_v12  ;;  %v3477_v40 = vrot.slane %v4781_v9, 9  ;;  %v1282_v23 = vrot.slane %v4786_v22, 5 }
  0x68   : > { %v6285_v27 = vcombine.low %v4604_v6, %v4607_v7  ;;  %v1277_v2 = vrot.slane %v1275_v0, 4  ;;  %v1278_v53 = vrot.slane %v4747_v29, 5  ;;  %v1285_v33 = vrot.slane %v4797_v46, 5  ;;  %v5047_v46 = vld [vmem:[%s6203_s1 + $0xc] sm:$0x3] }
  0x69   : > { %v1272_v50 = vsel %vm4963_vm7, %v1270_v28, %v1271_v19  ;;  %v1284_v56 = vrot.slane %v1282_v23, 4  ;;  %v1897_v30 = vsel %vm776_vm0, %v4707_v43, 0  ;;  %v1289_v1 = vrot.slane %v4829_v4, 5  ;;  %v5064_v19 = vld [vmem:[%s6203_s1 + $0xa] sm:$0x3] }
  0x6a   : > { %3864 = vmatprep.mubr.msk.bf16.mxu1 %vm727_vm3, %v6285_v27  ;;  %v5032_v37 = vcombine.low %v1269_v10, %v1272_v50  ;;  %v1669_v6 = vsel %vm776_vm0, %v4742_v24, 0  ;;  %v1276_v7 = vsel %vm4963_vm7, %v3476_v35, %v1275_v0  ;;  %v1283_v39 = vsel %vm4963_vm7, %v3477_v40, %v1282_v23 }
  0x6b   : > { %v1296_v29 = vrot.slane %v4875_v55, 5  ;;  %v1279_v43 = vsel %vm4963_vm7, %v1277_v2, %v1278_v53  ;;  %v1286_v24 = vsel %vm4963_vm7, %v1284_v56, %v1285_v33  ;;  %v3478_v54 = vrot.slane %v4824_v44, 9 }
  0x6c   : > { %3899 = vmatmul.mubr.msk.bf16.vlgmr.msra.gmra.mxu0 %vm727_vm3, %v5009_v47  ;;  %v1292_v38 = vrot.slane %v4841_v14, 5  ;;  %v1291_v21 = vrot.slane %v1289_v1, 4  ;;  %v3479_v8 = vrot.slane %v4864_v20, 9  ;;  %v1299_v42 = vrot.slane %v4883_v36, 5 }
  0x6d   : > { %3965 = vmatpush3.bf16.msra.mxu0 %v1897_v30  ;;  %3902 = vmatprep.mubr.msk.bf16.mxu0 %vm727_vm3, %v5032_v37  ;;  %v1298_v31 = vrot.slane %v1296_v29, 4  ;;  %v5072_v14 = vcombine.low %v1276_v7, %v1279_v43  ;;  %v5074_v10 = vcombine.low %v1283_v39, %v1286_v24  ;;  %v1290_v36 = vsel %vm4963_vm7, %v3478_v54, %v1289_v1 }
  0x6e   : > { %4143 = vmatprep.subr.msk.bf16.mxu0 %vm776_vm0, %v5047_v46  ;;  %v1293_v28 = vsel %vm4963_vm7, %v1291_v21, %v1292_v38  ;;  %v1297_v0 = vsel %vm4963_vm7, %v3479_v8, %v1296_v29  ;;  %v1303_v40 = vrot.slane %v4919_v62, 5  ;;  %v1313_v23 = vrot.slane %v4625_v17, 5  ;;  %v6286_v8 = vld [vmem:[#allocation23_spill] sm:$0xff] }
  0x6f   : > { %3865 = vmatmul.mubr.msk.bf16.vlgmr.msra.gmra.mxu1 %vm727_vm3, %v4975_v45  ;;  %v1300_v35 = vsel %vm4963_vm7, %v1298_v31, %v1299_v42  ;;  %v3480_v27 = vrot.slane %v4912_v51, 9  ;;  %v3481_v50 = vrot.slane %v4617_v13, 9  ;;  %v1310_v2 = vrot.slane %v4622_v16, 5  ;;  %v6287_v42 = vld [vmem:[#allocation27_spill] sm:$0xff] }
  0x70   : > { %3931 = vmatpush3.bf16.msra.mxu1 %v1669_v6  ;;  %3868 = vmatprep.mubr.msk.bf16.mxu1 %vm727_vm3, %v5002_v63  ;;  %v5093_v53 = vcombine.low %v4726_v3, %v4734_v18  ;;  %v5097_v33 = vcombine.low %v4781_v9, %v4786_v22  ;;  %v5101_v56 = vcombine.low %v4824_v44, %v4829_v4  ;;  %v1306_v3 = vrot.slane %v4924_v48, 5 }
  0x71   : > { %4142 = vmatprep.subr.msk.bf16.mxu1 %vm776_vm0, %v5064_v19  ;;  %v5105_v17 = vcombine.low %v4864_v20, %v4875_v55  ;;  %v5109_v30 = vcombine.low %v1290_v36, %v1293_v28  ;;  %v5111_v1 = vcombine.low %v1297_v0, %v1300_v35  ;;  %v5116_v18 = vcombine.low %v4755_v41, %v4762_v49  ;;  %v6288_v36 = vld [vmem:[#allocation25_spill] sm:$0xff] }
  0x72   : > { %v1305_v9 = vrot.slane %v1303_v40, 4  ;;  %v3484_v22 = vrot.slane %v4755_v41, 9  ;;  %v1331_v44 = vrot.slane %v4762_v49, 5  ;;  %v1334_v4 = vrot.slane %v4772_v57, 5 }
  0x73   : > { %v1304_v20 = vsel %vm4963_vm7, %v3480_v27, %v1303_v40  ;;  %v1311_v48 = vsel %vm4963_vm7, %v3481_v50, %v1310_v2  ;;  %v1312_v55 = vrot.slane %v1310_v2, 4  ;;  %v5129_v6 = vcombine.low %v4802_v52, %v4807_v61  ;;  %v6289_v40 = vld [vmem:[#allocation28_spill] sm:$0xff] }
  0x74   : > { %3903 = vmatmul.mubr.msk.bf16.gmra.mxu0 %vm727_vm3, %v5072_v14  ;;  %v1332_v41 = vsel %vm4963_vm7, %v3484_v22, %v1331_v44  ;;  %v1333_v49 = vrot.slane %v1331_v44, 4  ;;  %v3485_v57 = vrot.slane %v4802_v52, 9  ;;  %v1338_v7 = vrot.slane %v4807_v61, 5 }
  0x75   : > { %3906 = vmatprep.mubr.msk.bf16.mxu0 %vm727_vm3, %v5074_v10  ;;  %v1317_v39 = vrot.slane %v4662_v59, 5  ;;  %v1341_v29 = vrot.slane %v4819_v34, 5  ;;  %v5143_v43 = vcombine.low %v4846_v26, %v4853_v25  ;;  %v3486_v24 = vrot.slane %v4846_v26, 9 }
  0x76   : > { %v1307_v54 = vsel %vm4963_vm7, %v1305_v9, %v1306_v3  ;;  %v1335_v52 = vsel %vm4963_vm7, %v1333_v49, %v1334_v4  ;;  %v1339_v61 = vsel %vm4963_vm7, %v3485_v57, %v1338_v7  ;;  %v1340_v38 = vrot.slane %v1338_v7, 4  ;;  %v6290_v3 = vld [vmem:[#allocation30_spill] sm:$0xff]  ;;  %v6291_v57 = vld [vmem:[#allocation15_spill] sm:$0xff] }
  0x77   : > { %3869 = vmatmul.mubr.msk.bf16.gmra.mxu1 %vm727_vm3, %v5093_v53  ;;  %v5152_v21 = vcombine.low %v1332_v41, %v1335_v52  ;;  %v1345_v34 = vrot.slane %v4853_v25, 5  ;;  %v1348_v31 = vrot.slane %v6286_v8, 5  ;;  %v5158_v28 = vcombine.low %v6288_v36, %v6287_v42 }
  0x78   : > { %3872 = vmatprep.mubr.msk.bf16.mxu1 %vm727_vm3, %v5097_v33  ;;  %v1342_v26 = vsel %vm4963_vm7, %v1340_v38, %v1341_v29  ;;  %v3487_v0 = vrot.slane %v6288_v36, 9  ;;  %v1352_v35 = vrot.slane %v6287_v42, 5  ;;  %v1355_v27 = vrot.slane %v6289_v40, 5  ;;  %v6293_v42 = vld [vmem:[#allocation11_spill] sm:$0xff] }
  0x79   : > { %v5167_v50 = vcombine.low %v1339_v61, %v1342_v26  ;;  %v1346_v25 = vsel %vm4963_vm7, %v3486_v24, %v1345_v34  ;;  %v1347_v2 = vrot.slane %v1345_v34, 4  ;;  %v5173_v9 = vcombine.low %v6290_v3, %v4941_v11 }
  0x7a   : > { %v1353_v22 = vsel %vm4963_vm7, %v3487_v0, %v1352_v35  ;;  %v1354_v44 = vrot.slane %v1352_v35, 4  ;;  %v3488_v4 = vrot.slane %v6290_v3, 9  ;;  %v1359_v41 = vrot.slane %v4941_v11, 5  ;;  %v6294_v0 = vld [vmem:[#allocation13_spill] sm:$0xff] }
  0x7b   : > { %v1314_v49 = vsel %vm4963_vm7, %v1312_v55, %v1313_v23  ;;  %v1324_v7 = vrot.slane %v6291_v57, 5  ;;  %v1349_v29 = vsel %vm4963_vm7, %v1347_v2, %v1348_v31  ;;  %v1362_v24 = vrot.slane %v4952_v58, 5  ;;  %v6292_v55 = vld [vmem:[#allocation10_spill] sm:$0xff] }
  0x7c   : > { %3907 = vmatmul.mubr.msk.bf16.gmra.mxu0 %vm727_vm3, %v5109_v30  ;;  %v5189_v52 = vcombine.low %v1346_v25, %v1349_v29  ;;  %v1356_v61 = vsel %vm4963_vm7, %v1354_v44, %v1355_v27  ;;  %v1360_v11 = vsel %vm4963_vm7, %v3488_v4, %v1359_v41  ;;  %v1361_v38 = vrot.slane %v1359_v41, 4  ;;  %v6295_v27 = vld [vmem:[#allocation16_spill] sm:$0xff]  ;;  %v285_v41 = vld [vmem:[%s4595_s22 + $0xc8] sm:$0x1] }
  0x7d   : > { %3910 = vmatprep.mubr.msk.bf16.mxu0 %vm727_vm3, %v5111_v1  ;;  %v5197_v23 = vcombine.low %v1304_v20, %v1307_v54  ;;  %v3482_v34 = vrot.slane %v6292_v55, 9  ;;  %v5200_v58 = vcombine.low %v1353_v22, %v1356_v61  ;;  %v5202_v8 = vcombine.low %v1311_v48, %v1314_v49  ;;  %v5276_v4 = vld [vmem:[%s4595_s22 + $0xc0] sm:$0xf]  ;;  %v6296_v61 = vld [vmem:[#allocation14_spill] sm:$0xff] }
  0x7e   : > { %v1319_v31 = vrot.slane %v1317_v39, 4  ;;  %v1320_v36 = vrot.slane %v6293_v42, 5  ;;  %v1363_v26 = vsel %vm4963_vm7, %v1361_v38, %v1362_v24  ;;  %v3483_v35 = vrot.slane %v6294_v0, 9  ;;  %v6298_v42 = vld [vmem:[#allocation20_spill] sm:$0xff] }
  0x7f   : > { %3873 = vmatmul.mubr.msk.bf16.gmra.mxu1 %vm727_vm3, %v5101_v56  ;;  %v1326_v40 = vrot.slane %v1324_v7, 4  ;;  %v1327_v25 = vrot.slane %v6295_v27, 5  ;;  %v5209_v2 = vcombine.low %v1360_v11, %v1363_v26  ;;  %v5213_v20 = vcombine.low %v4912_v51, %v4919_v62  ;;  %v6302_v26 = vld [vmem:[#allocation12_spill] sm:$0xff] }
  0x80   : > { %3876 = vmatprep.mubr.msk.bf16.mxu1 %vm727_vm3, %v5105_v17  ;;  %v5219_v48 = vcombine.low %v4617_v13, %v4622_v16  ;;  %v1318_v54 = vsel %vm4963_vm7, %v3482_v34, %v1317_v39  ;;  %v1321_v3 = vsel %vm4963_vm7, %v1319_v31, %v1320_v36  ;;  %v1325_v51 = vsel %vm4963_vm7, %v3483_v35, %v1324_v7  ;;  %v6297_v34 = vld [vmem:[#allocation18_spill] sm:$0xff]  ;;  %v6301_v36 = vld [vmem:[#allocation31_spill] sm:$0xff] }
  0x81   : > { %v1328_v62 = vsel %vm4963_vm7, %v1326_v40, %v1327_v25  ;;  %v5235_v13 = vcombine.low %v1318_v54, %v1321_v3  ;;  %v5241_v39 = vcombine.low %v6292_v55, %v4662_v59  ;;  %v5247_v22 = vcombine.low %v6294_v0, %v6291_v57  ;;  %v5270_v59 = vld [vmem:[%s4595_s22 + $0xc4] sm:$0xf]  ;;  %v3614_v55 = vld [vmem:[%s6203_s1 + $0x10] sm:$0x3]  ;;  %v6304_v35 = vld [vmem:[#allocation19_spill] sm:$0xff] }
  0x82   : > { %v5237_v16 = vcombine.low %v1325_v51, %v1328_v62  ;;  %v2095_v44 = vrot.slane %v5270_v59, 5  ;;  %v3558_v49 = vrot.slane %v5276_v4, 9  ;;  %v2098_v7 = vrot.slane %v285_v41, 5  ;;  %v6303_v0 = vld [vmem:[#allocation17_spill] sm:$0xff] }
  0x83   : > { %v2315_v38 = vsel %vm776_vm0, %v5047_v46, 0  ;;  %v2109_v31 = vsel %vm776_vm0, %v5064_v19, 0  ;;  %v6299_v46 = vld [vmem:[#allocation22_spill] sm:$0xff]  ;;  %v6305_v40 = vld [vmem:[#allocation21_spill] sm:$0xff]  ;;  %v1865_v27 = vshrl.u32 %v5276_v4, 16  ;;  %v1868_v25 = vshll.u32 %v5276_v4, 16 }
  0x84   : > { %3911 = vmatmul.mubr.msk.bf16.gmra.mxu0 %vm727_vm3, %v5197_v23  ;;  %v2097_v57 = vrot.slane %v2095_v44, 4  ;;  %v2096_v29 = vsel %vm4963_vm7, %v3558_v49, %v2095_v44  ;;  %v6300_v19 = vld [vmem:[#allocation26_spill] sm:$0xff]  ;;  %v1878_v54 = vshrl.u32 %v5270_v59, 16  ;;  %v1874_v3 = vshll.u32 %v5270_v59, 16 }
  0x85   : > { %3914 = vmatprep.mubr.msk.bf16.mxu0 %vm727_vm3, %v5202_v8  ;;  %v1867_v51 = vrot.slane %v1865_v27, 4  ;;  %v1870_v62 = vrot.slane %v1868_v25, 5 }
  0x86   : > { %v2099_v24 = vsel %vm4963_vm7, %v2097_v57, %v2098_v7  ;;  %v1876_v44 = vrot.slane %v1874_v3, 5  ;;  %v1880_v49 = vrot.slane %v1878_v54, 4  ;;  %v6306_v57 = vld [vmem:[#allocation24_spill] sm:$0xff]  ;;  %v6307_v7 = vld [vmem:[#allocation29_spill] sm:$0xff]  ;;  %v3523_v3 = vcombine.low %v5276_v4, %v5270_v59 }
  0x87   : > { %3877 = vmatmul.mubr.msk.bf16.gmra.mxu1 %vm727_vm3, %v5213_v20  ;;  %v5288_v11 = vcombine.low %v2096_v29, %v2099_v24  ;;  %v1871_v29 = vor.u32 %v1870_v62, %v1867_v51  ;;  %v2755_v51 = vsel %vm776_vm0, %v3614_v55, 0 }
  0x88   : > { %3880 = vmatprep.mubr.msk.bf16.mxu1 %vm727_vm3, %v5219_v48  ;;  %v1881_v24 = vor.u32 %v1880_v49, %v1876_v44 }
  0x8c   : > { %3915 = vmatmul.mubr.msk.bf16.gmra.mxu0 %vm727_vm3, %v5235_v13 }
  0x8d   : > { %3918 = vmatprep.mubr.msk.bf16.mxu0 %vm727_vm3, %v5237_v16 }
  0x8f   : > { %3881 = vmatmul.mubr.msk.bf16.gmra.mxu1 %vm727_vm3, %v5241_v39 }
  0x90   : > { %3884 = vmatprep.mubr.msk.bf16.mxu1 %vm727_vm3, %v5247_v22 }
  0x94   : > { %3919 = vmatmul.mubr.msk.bf16.gmra.mxu0 %vm727_vm3, %v5152_v21 }
  0x95   : > { %3922 = vmatprep.mubr.msk.bf16.mxu0 %vm727_vm3, %v5167_v50 }
  0x97   : > { %3885 = vmatmul.mubr.msk.bf16.gmra.mxu1 %vm727_vm3, %v5116_v18 }
  0x98   : > { %3888 = vmatprep.mubr.msk.bf16.mxu1 %vm727_vm3, %v5129_v6 }
  0x9c   : > { %3923 = vmatmul.mubr.msk.bf16.gmra.mxu0 %vm727_vm3, %v5189_v52 }
  0x9d   : > { %3926 = vmatprep.mubr.msk.bf16.mxu0 %vm727_vm3, %v5200_v58 }
  0x9f   : > { %3889 = vmatmul.mubr.msk.bf16.gmra.mxu1 %vm727_vm3, %v5143_v43 }
  0xa0   : > { %3892 = vmatprep.mubr.msk.bf16.mxu1 %vm727_vm3, %v5158_v28 }
  0xa4   : > { %3927 = vmatmul.mubr.msk.bf16.gmra.mxu0 %vm727_vm3, %v5209_v2 }
  0xa5   : > { %3966 = vmatprep.mubr.msk.bf16.mxu0 %vm727_vm3, %v6296_v61  ;;  %v1884_v61 = vshll.u32 %v285_v41, 16 }
  0xa7   : > { %3893 = vmatmul.mubr.msk.bf16.gmra.mxu1 %vm727_vm3, %v5173_v9  ;;  %v1886_v27 = vrot.slane %v1884_v61, 5  ;;  %v5480_v61 = vld [vmem:[%s4595_s22 + $0xd0] sm:$0xf] }
  0xa8   : > { %3932 = vmatprep.mubr.msk.bf16.mxu1 %vm727_vm3, %v4975_v45  ;;  %v3595_v45 = vld [vmem:[%s6203_s1 + $0xe] sm:$0x3] }
  0xa9   : > { %v2543_v62 = vsel %vm776_vm0, %v3595_v45, 0 }
  0xac   : > { %3967 = vmatmul.mubr.msk.bf16.vlgmr.msra.gmra.mxu0 %vm727_vm3, %v6297_v34 }
  0xad   : > { %4033 = vmatpush3.bf16.msra.mxu0 %v2315_v38  ;;  %3970 = vmatprep.mubr.msk.bf16.mxu0 %vm727_vm3, %v6298_v42  ;;  %v1872_v38 = vrot.slane %v1871_v29, 4 }
  0xae   : > { %4145 = vmatprep.subr.msk.bf16.mxu0 %vm776_vm0, %v3614_v55 }
  0xaf   : > { %3933 = vmatmul.mubr.msk.bf16.vlgmr.msra.gmra.mxu1 %vm727_vm3, %v5002_v63  ;;  %v1877_v25 = vsel %vm4640_vm4, %v1872_v38, %v1876_v44 }
  0xb0   : > { %3999 = vmatpush3.bf16.msra.mxu1 %v2109_v31  ;;  %3936 = vmatprep.mubr.msk.bf16.mxu1 %vm727_vm3, %v5093_v53  ;;  %v1882_v31 = vrot.slane %v1881_v24, 4 }
  0xb1   : > { %4144 = vmatprep.subr.msk.bf16.mxu1 %vm776_vm0, %v3595_v45 }
  0xb2   : > { %v1887_v41 = vsel %vm4640_vm4, %v1882_v31, %v1886_v27 }
  0xb3   : > { %v5370_v54 = vcombine.low %v1877_v25, %v1887_v41 }
  0xb4   : > { %3971 = vmatmul.mubr.msk.bf16.gmra.mxu0 %vm727_vm3, %v6299_v46 }
  0xb5   : > { %3974 = vmatprep.mubr.msk.bf16.mxu0 %vm727_vm3, %v6300_v19  ;;  %6308 = vst [vmem:[#allocation23_spill] sm:$0xff] %v5370_v54 }
  0xb7   : > { %3937 = vmatmul.mubr.msk.bf16.gmra.mxu1 %vm727_vm3, %v5097_v33 }
  0xb8   : > { %3940 = vmatprep.mubr.msk.bf16.mxu1 %vm727_vm3, %v5101_v56 }
  0xbc   : > { %3975 = vmatmul.mubr.msk.bf16.gmra.mxu0 %vm727_vm3, %v6301_v36 }
  0xbd   : > { %3978 = vmatprep.mubr.msk.bf16.mxu0 %vm727_vm3, %v4984_v15 }
  0xbf   : > { %3941 = vmatmul.mubr.msk.bf16.gmra.mxu1 %vm727_vm3, %v5105_v17 }
  0xc0   : > { %3944 = vmatprep.mubr.msk.bf16.mxu1 %vm727_vm3, %v5213_v20 }
  0xc4   : > { %3979 = vmatmul.mubr.msk.bf16.gmra.mxu0 %vm727_vm3, %v6302_v26 }
  0xc5   : > { %3982 = vmatprep.mubr.msk.bf16.mxu0 %vm727_vm3, %v6303_v0 }
  0xc7   : > { %3945 = vmatmul.mubr.msk.bf16.gmra.mxu1 %vm727_vm3, %v5219_v48 }
  0xc8   : > { %3948 = vmatprep.mubr.msk.bf16.mxu1 %vm727_vm3, %v5241_v39 }
  0xcc   : > { %3983 = vmatmul.mubr.msk.bf16.gmra.mxu0 %vm727_vm3, %v6304_v35 }
  0xcd   : > { %3986 = vmatprep.mubr.msk.bf16.mxu0 %vm727_vm3, %v6305_v40 }
  0xcf   : > { %3949 = vmatmul.mubr.msk.bf16.gmra.mxu1 %vm727_vm3, %v5247_v22 }
  0xd0   : > { %3952 = vmatprep.mubr.msk.bf16.mxu1 %vm727_vm3, %v5116_v18 }
  0xd4   : > { %3987 = vmatmul.mubr.msk.bf16.gmra.mxu0 %vm727_vm3, %v6306_v57 }
  0xd5   : > { %3990 = vmatprep.mubr.msk.bf16.mxu0 %vm727_vm3, %v6307_v7 }
  0xd7   : > { %3953 = vmatmul.mubr.msk.bf16.gmra.mxu1 %vm727_vm3, %v5129_v6 }
  0xd8   : > { %3956 = vmatprep.mubr.msk.bf16.mxu1 %vm727_vm3, %v5143_v43 }
  0xdc   : > { %3991 = vmatmul.mubr.msk.bf16.gmra.mxu0 %vm727_vm3, %v4958_v5 }
  0xdd   : > { %3994 = vmatprep.mubr.msk.bf16.mxu0 %vm727_vm3, %v5012_v12 }
  0xdf   : > { %3957 = vmatmul.mubr.msk.bf16.gmra.mxu1 %vm727_vm3, %v5158_v28 }
  0xe0   : > { %3960 = vmatprep.mubr.msk.bf16.mxu1 %vm727_vm3, %v5173_v9 }
  0xe4   : > { %3995 = vmatmul.mubr.msk.bf16.gmra.mxu0 %vm727_vm3, %v5370_v54 }
  0xe5   : > { %4034 = vmatprep.mubr.msk.bf16.mxu0 %vm727_vm3, %v5002_v63 }
  0xe7   : > { %3961 = vmatmul.mubr.msk.bf16.gmra.mxu1 %vm727_vm3, %v3523_v3 }
  0xe8   : > { %4000 = vmatprep.mubr.msk.bf16.mxu1 %vm727_vm3, %v5009_v47 }
  0xec   : > { %4035 = vmatmul.mubr.msk.bf16.vlgmr.msra.gmra.mxu0 %vm727_vm3, %v5093_v53 }
  0xed   : > { %4101 = vmatpush3.bf16.msra.mxu0 %v2755_v51  ;;  %4038 = vmatprep.mubr.msk.bf16.mxu0 %vm727_vm3, %v5097_v33 }
  0xef   : > { %4001 = vmatmul.mubr.msk.bf16.vlgmr.msra.gmra.mxu1 %vm727_vm3, %v5032_v37 }
  0xf0   : > { %4067 = vmatpush3.bf16.msra.mxu1 %v2543_v62  ;;  %4004 = vmatprep.mubr.msk.bf16.mxu1 %vm727_vm3, %v5072_v14  ;;  %v5393_v63 = vpop.f32.mrf.mxu0 }
  0xf2   : > { %v5403_v53 = vpop.f32.mrf.mxu0 }
  0xf4   : > { %4039 = vmatmul.mubr.msk.bf16.gmra.mxu0 %vm727_vm3, %v5101_v56  ;;  %v5409_v56 = vpop.f32.mrf.mxu0 }
  0xf5   : > { %4042 = vmatprep.mubr.msk.bf16.mxu0 %vm727_vm3, %v5105_v17  ;;  %v5399_v47 = vpop.f32.mrf.mxu1 }
  0xf6   : > { %v5419_v59 = vpop.f32.mrf.mxu0 }
  0xf7   : > { %4005 = vmatmul.mubr.msk.bf16.gmra.mxu1 %vm727_vm3, %v5074_v10  ;;  %v5405_v33 = vpop.f32.mrf.mxu1 }
  0xf8   : > { %4008 = vmatprep.mubr.msk.bf16.mxu1 %vm727_vm3, %v5109_v30 }
  0xf9   : > { %v5415_v17 = vpop.f32.mrf.mxu1 }
  0xfb   : > { %v5421_v4 = vpop.f32.mrf.mxu1 }
  0xfc   : > { %4043 = vmatmul.mubr.msk.bf16.gmra.mxu0 %vm727_vm3, %v5213_v20 }
  0xfd   : > { %4046 = vmatprep.mubr.msk.bf16.mxu0 %vm727_vm3, %v5219_v48 }
  0xff   : > { %4009 = vmatmul.mubr.msk.bf16.gmra.mxu1 %vm727_vm3, %v5111_v1 }
 0x100   : > { %4012 = vmatprep.mubr.msk.bf16.mxu1 %vm727_vm3, %v5197_v23 }
 0x101   : > { %v5425_v20 = vpop.f32.mrf.mxu0 }
 0x103   : > { %v5435_v55 = vpop.f32.mrf.mxu0 }
 0x104   : > { %4047 = vmatmul.mubr.msk.bf16.gmra.mxu0 %vm727_vm3, %v5241_v39 }
 0x105   : > { %4050 = vmatprep.mubr.msk.bf16.mxu0 %vm727_vm3, %v5247_v22  ;;  %v5431_v48 = vpop.f32.mrf.mxu1  ;;  %v5441_v39 = vpop.f32.mrf.mxu0 }
 0x107   : > { %4013 = vmatmul.mubr.msk.bf16.gmra.mxu1 %vm727_vm3, %v5202_v8  ;;  %v5437_v45 = vpop.f32.mrf.mxu1  ;;  %v5451_v44 = vpop.f32.mrf.mxu0 }
 0x108   : > { %4016 = vmatprep.mubr.msk.bf16.mxu1 %vm727_vm3, %v5235_v13 }
 0x109   : > { %v5447_v22 = vpop.f32.mrf.mxu1 }
 0x10b   : > { %v5453_v49 = vpop.f32.mrf.mxu1 }
 0x10c   : > { %4051 = vmatmul.mubr.msk.bf16.gmra.mxu0 %vm727_vm3, %v5116_v18 }
 0x10d   : > { %4054 = vmatprep.mubr.msk.bf16.mxu0 %vm727_vm3, %v5129_v6 }
 0x10f   : > { %4017 = vmatmul.mubr.msk.bf16.gmra.mxu1 %vm727_vm3, %v5237_v16 }
 0x110   : > { %4020 = vmatprep.mubr.msk.bf16.mxu1 %vm727_vm3, %v5152_v21 }
 0x112   : > { %v5457_v18 = vpop.f32.mrf.mxu0 }
 0x114   : > { %4055 = vmatmul.mubr.msk.bf16.gmra.mxu0 %vm727_vm3, %v5143_v43  ;;  %v5467_v29 = vpop.f32.mrf.mxu0 }
 0x115   : > { %4058 = vmatprep.mubr.msk.bf16.mxu0 %vm727_vm3, %v5158_v28  ;;  %v5477_v28 = vld [vmem:[%s4595_s22 + $0xcc] sm:$0xf] }
 0x116   : > { %v5473_v43 = vpop.f32.mrf.mxu0 }
 0x117   : > { %4021 = vmatmul.mubr.msk.bf16.gmra.mxu1 %vm727_vm3, %v5167_v50  ;;  %v5463_v6 = vpop.f32.mrf.mxu1 }
 0x118   : > { %6309 = vst [vmem:[#allocation27_spill] sm:$0xff] %v5463_v6  ;;  %4024 = vmatprep.mubr.msk.bf16.mxu1 %vm727_vm3, %v5189_v52  ;;  %v5486_v31 = vpop.f32.mrf.mxu0 }
 0x119   : > { %v5469_v24 = vpop.f32.mrf.mxu1 }
 0x11a   : > { %6310 = vst [vmem:[#allocation25_spill] sm:$0xff] %v5469_v24 }
 0x11b   : > { %v5484_v38 = vpop.f32.mrf.mxu1 }
 0x11c   : > { %4059 = vmatmul.mubr.msk.bf16.gmra.mxu0 %vm727_vm3, %v5173_v9  ;;  %6311 = vst [vmem:[#allocation28_spill] sm:$0xff] %v5484_v38  ;;  %v3578_v9 = vcombine.low %v5477_v28, %v5480_v61 }
 0x11d   : > { %4062 = vmatprep.mubr.msk.bf16.mxu0 %vm727_vm3, %v3523_v3  ;;  %v5492_v27 = vpop.f32.mrf.mxu1 }
 0x11e   : > { %6312 = vst [vmem:[#allocation30_spill] sm:$0xff] %v5492_v27 }
 0x11f   : > { %4025 = vmatmul.mubr.msk.bf16.gmra.mxu1 %vm727_vm3, %v5200_v58 }
 0x120   : > { %4028 = vmatprep.mubr.msk.bf16.mxu1 %vm727_vm3, %v5209_v2 }
 0x124   : > { %v5494_v25 = vpop.f32.mrf.mxu0  ;;  %4063 = vmatmul.mubr.msk.bf16.gmra.mxu0 %vm727_vm3, %v3578_v9 }
 0x125   : > { %4102 = vmatprep.mubr.msk.bf16.mxu0 %vm727_vm3, %v5032_v37 }
 0x126   : > { %v5499_v41 = vpop.f32.mrf.mxu0 }
 0x127   : > { %v5501_v3 = vpop.f32.mrf.mxu1  ;;  %4029 = vmatmul.mubr.msk.bf16.gmra.mxu1 %vm727_vm3, %v5288_v11 }
 0x128   : > { %6313 = vst [vmem:[#allocation15_spill] sm:$0xff] %v5501_v3  ;;  %v5505_v51 = vpop.f32.mrf.mxu0  ;;  %4068 = vmatprep.mubr.msk.bf16.mxu1 %vm727_vm3, %v6297_v34 }
 0x129   : > { %v5509_v62 = vpop.f32.mrf.mxu1 }
 0x12a   : > { %6314 = vst [vmem:[#allocation10_spill] sm:$0xff] %v5509_v62  ;;  %v5511_v27 = vpop.f32.mrf.mxu0 }
 0x12b   : > { %v5513_v9 = vpop.f32.mrf.mxu1 }
 0x12c   : > { %6315 = vst [vmem:[#allocation11_spill] sm:$0xff] %v5513_v9  ;;  %v3900_v38 = vpop.f32.mrf.mxu0  ;;  %4103 = vmatmul.mubr.msk.bf16.vlgmr.msra.gmra.mxu0 %vm727_vm3, %v5072_v14 }
 0x12d   : > { %v5517_v37 = vpop.f32.mrf.mxu1  ;;  %4106 = vmatprep.mubr.msk.bf16.mxu0 %vm727_vm3, %v5074_v10 }
 0x12e   : > { %6316 = vst [vmem:[#allocation13_spill] sm:$0xff] %v5517_v37  ;;  %v1499_v3 = vpop.f32.mrf.mxu0 }
 0x12f   : > { %v3866_v24 = vpop.f32.mrf.mxu1  ;;  %4069 = vmatmul.mubr.msk.bf16.vlgmr.msra.gmra.mxu1 %vm727_vm3, %v6298_v42 }
 0x130   : > { %v1115_v34 = vadd.f32 %v3866_v24, %v5393_v63  ;;  %v3901_v62 = vpop.f32.mrf.mxu0  ;;  %4072 = vmatprep.mubr.msk.bf16.mxu1 %vm727_vm3, %v6299_v46 }
 0x131   : > { %v1106_v9 = vpop.f32.mrf.mxu1 }
 0x132   : > { %v5526_v54 = vadd.f32 %v3900_v38, %v1115_v34  ;;  %v1107_v14 = vadd.f32 %v1106_v9, %v5403_v53  ;;  %v1502_v37 = vpop.f32.mrf.mxu0 }
 0x133   : > { %v3867_v6 = vpop.f32.mrf.mxu1 }
 0x134   : > { %v5529_v32 = vadd.f32 %v1499_v3, %v1107_v14  ;;  %v1118_v10 = vadd.f32 %v3867_v6, %v5409_v56  ;;  %v3904_v12 = vpop.f32.mrf.mxu0  ;;  %4107 = vmatmul.mubr.msk.bf16.gmra.mxu0 %vm727_vm3, %v5109_v30 }
 0x135   : > { %v1109_v42 = vpop.f32.mrf.mxu1  ;;  %4110 = vmatprep.mubr.msk.bf16.mxu0 %vm727_vm3, %v5111_v1 }
 0x136   : > { %v5536_v46 = vadd.f32 %v3901_v62, %v1118_v10  ;;  %v1110_v63 = vadd.f32 %v1109_v42, %v5419_v59  ;;  %v1515_v24 = vpop.f32.mrf.mxu0 }
 0x137   : > { %v3870_v53 = vpop.f32.mrf.mxu1  ;;  %4073 = vmatmul.mubr.msk.bf16.gmra.mxu1 %vm727_vm3, %v6300_v19 }
 0x138   : > { %v5541_v38 = vadd.f32 %v1502_v37, %v1110_v63  ;;  %v1131_v56 = vadd.f32 %v3870_v53, %v5425_v20  ;;  %v3905_v6 = vpop.f32.mrf.mxu0  ;;  %4076 = vmatprep.mubr.msk.bf16.mxu1 %vm727_vm3, %v6301_v36 }
 0x139   : > { %v1122_v30 = vpop.f32.mrf.mxu1 }
 0x13a   : > { %v5546_v3 = vadd.f32 %v3904_v12, %v1131_v56  ;;  %v1123_v1 = vadd.f32 %v1122_v30, %v5435_v55  ;;  %v1518_v62 = vpop.f32.mrf.mxu0 }
 0x13b   : > { %v3871_v59 = vpop.f32.mrf.mxu1 }
 0x13c   : > { %v5549_v9 = vadd.f32 %v1515_v24, %v1123_v1  ;;  %v1134_v34 = vadd.f32 %v3871_v59, %v5441_v39  ;;  %v3908_v19 = vpop.f32.mrf.mxu0  ;;  %4111 = vmatmul.mubr.msk.bf16.gmra.mxu0 %vm727_vm3, %v5197_v23 }
 0x13d   : > { %v1125_v20 = vpop.f32.mrf.mxu1  ;;  %4114 = vmatprep.mubr.msk.bf16.mxu0 %vm727_vm3, %v5202_v8 }
 0x13e   : > { %v5556_v36 = vadd.f32 %v3905_v6, %v1134_v34  ;;  %v1126_v12 = vadd.f32 %v1125_v20, %v5451_v44  ;;  %v1531_v37 = vpop.f32.mrf.mxu0 }
 0x13f   : > { %v3874_v55 = vpop.f32.mrf.mxu1  ;;  %4077 = vmatmul.mubr.msk.bf16.gmra.mxu1 %vm727_vm3, %v4984_v15 }
 0x140   : > { %v5561_v14 = vadd.f32 %v1518_v62, %v1126_v12  ;;  %v1147_v39 = vadd.f32 %v3874_v55, %v5457_v18  ;;  %v3909_v10 = vpop.f32.mrf.mxu0  ;;  %4080 = vmatprep.mubr.msk.bf16.mxu1 %vm727_vm3, %v6302_v26 }
 0x141   : > { %v1138_v23 = vpop.f32.mrf.mxu1 }
 0x142   : > { %v5566_v42 = vadd.f32 %v3908_v19, %v1147_v39  ;;  %v1139_v8 = vadd.f32 %v1138_v23, %v5467_v29  ;;  %v1534_v63 = vpop.f32.mrf.mxu0 }
 0x143   : > { %v3875_v44 = vpop.f32.mrf.mxu1 }
 0x144   : > { %v5569_v24 = vadd.f32 %v1531_v37, %v1139_v8  ;;  %v1150_v53 = vadd.f32 %v3875_v44, %v5473_v43  ;;  %v3912_v15 = vpop.f32.mrf.mxu0  ;;  %4115 = vmatmul.mubr.msk.bf16.gmra.mxu0 %vm727_vm3, %v5235_v13  ;;  %v2514_v37 = vshll.u32 %v5477_v28, 16 }
 0x145   : > { %v1141_v18 = vpop.f32.mrf.mxu1  ;;  %4118 = vmatprep.mubr.msk.bf16.mxu0 %vm727_vm3, %v5237_v16 }
 0x146   : > { %v5576_v26 = vadd.f32 %v3909_v10, %v1150_v53  ;;  %v1142_v56 = vadd.f32 %v1141_v18, %v5486_v31  ;;  %v1547_v6 = vpop.f32.mrf.mxu0  ;;  %v2516_v44 = vrot.slane %v2514_v37, 5 }
 0x147   : > { %v3878_v29 = vpop.f32.mrf.mxu1  ;;  %4081 = vmatmul.mubr.msk.bf16.gmra.mxu1 %vm727_vm3, %v6303_v0 }
 0x148   : > { %v5581_v30 = vadd.f32 %v1534_v63, %v1142_v56  ;;  %v1163_v43 = vadd.f32 %v3878_v29, %v5494_v25  ;;  %v3913_v1 = vpop.f32.mrf.mxu0  ;;  %4084 = vmatprep.mubr.msk.bf16.mxu1 %vm727_vm3, %v6304_v35 }
 0x149   : > { %v1154_v13 = vpop.f32.mrf.mxu1 }
 0x14a   : > { %v5586_v62 = vadd.f32 %v3912_v15, %v1163_v43  ;;  %v1155_v16 = vadd.f32 %v1154_v13, %v5499_v41  ;;  %v1550_v59 = vpop.f32.mrf.mxu0  ;;  %v2511_v41 = vshrl.u32 %v5477_v28, 16 }
 0x14b   : > { %v3879_v31 = vpop.f32.mrf.mxu1 }
 0x14c   : > { %v5589_v34 = vadd.f32 %v1547_v6, %v1155_v16  ;;  %v1166_v19 = vadd.f32 %v3879_v31, %v5505_v51  ;;  %v3916_v0 = vpop.f32.mrf.mxu0  ;;  %4119 = vmatmul.mubr.msk.bf16.gmra.mxu0 %vm727_vm3, %v5152_v21  ;;  %v2520_v51 = vshll.u32 %v5480_v61, 16  ;;  %v2524_v21 = vshrl.u32 %v5480_v61, 16 }
 0x14d   : > { %v1157_v25 = vpop.f32.mrf.mxu1  ;;  %4122 = vmatprep.mubr.msk.bf16.mxu0 %vm727_vm3, %v5167_v50 }
 0x14e   : > { %v5596_v35 = vadd.f32 %v3913_v1, %v1166_v19  ;;  %v1158_v20 = vadd.f32 %v1157_v25, %v5511_v27  ;;  %v1563_v12 = vpop.f32.mrf.mxu0  ;;  %v2522_v15 = vrot.slane %v2520_v51, 5  ;;  %v2526_v18 = vrot.slane %v2524_v21, 4 }
 0x14f   : > { %v3882_v55 = vpop.f32.mrf.mxu1  ;;  %4085 = vmatmul.mubr.msk.bf16.gmra.mxu1 %vm727_vm3, %v6305_v40  ;;  %v2513_v40 = vrot.slane %v2511_v41, 4  ;;  %v3613_v19 = vrot.slane %v5477_v28, 9 }
 0x150   : > { %v5605_v39 = vadd.f32 %v1550_v59, %v1158_v20  ;;  %v1179_v50 = vadd.f32 %v3882_v55, %v5399_v47  ;;  %v3917_v10 = vpop.f32.mrf.mxu0  ;;  %4088 = vmatprep.mubr.msk.bf16.mxu1 %vm727_vm3, %v6306_v57  ;;  %v2741_v57 = vrot.slane %v5480_v61, 5 }
 0x151   : > { %v1170_v27 = vpop.f32.mrf.mxu1 }
 0x152   : > { %v5610_v23 = vadd.f32 %v3916_v0, %v1179_v50  ;;  %v1171_v8 = vadd.f32 %v1170_v27, %v5405_v33  ;;  %v1566_v63 = vpop.f32.mrf.mxu0  ;;  %v288_v33 = vld [vmem:[%s4595_s22 + $0xd4] sm:$0x1]  ;;  %s5981_s22 = scalar_lea.vmem [#allocation2], %s4579_s7 }
 0x153   : > { %v3883_v53 = vpop.f32.mrf.mxu1  ;;  %v2530_v31 = vshll.u32 %v288_v33, 16  ;;  %v2744_v25 = vrot.slane %v288_v33, 5 }
 0x154   : > { %v5613_v56 = vadd.f32 %v1563_v12, %v1171_v8  ;;  %v1182_v47 = vadd.f32 %v3883_v53, %v5415_v17  ;;  %v3920_v6 = vpop.f32.mrf.mxu0  ;;  %4123 = vmatmul.mubr.msk.bf16.gmra.mxu0 %vm727_vm3, %v5189_v52  ;;  %v2517_v17 = vor.u32 %v2516_v44, %v2513_v40 }
 0x155   : > { %v1173_v29 = vpop.f32.mrf.mxu1  ;;  %4126 = vmatprep.mubr.msk.bf16.mxu0 %vm727_vm3, %v5200_v58  ;;  %v2527_v58 = vor.u32 %v2526_v18, %v2522_v15  ;;  %v2532_v28 = vrot.slane %v2530_v31, 5 }
 0x156   : > { %v5622_v43 = vadd.f32 %v3917_v10, %v1182_v47  ;;  %v1174_v1 = vadd.f32 %v1173_v29, %v5421_v4  ;;  %v1579_v13 = vpop.f32.mrf.mxu0  ;;  %v2743_v4 = vrot.slane %v2741_v57, 4  ;;  %v2518_v37 = vrot.slane %v2517_v17, 4  ;;  %v6320_v47 = vld [vmem:[#allocation23_spill] sm:$0xff]  ;;  %v6321_v29 = vld [vmem:[#allocation25_spill] sm:$0xff]  ;;  %v6322_v17 = vld [vmem:[#allocation28_spill] sm:$0xff] }
 0x157   : > { %v3886_v16 = vpop.f32.mrf.mxu1  ;;  %4089 = vmatmul.mubr.msk.bf16.gmra.mxu1 %vm727_vm3, %v6307_v7 }
 0x158   : > { %v5627_v59 = vadd.f32 %v1566_v63, %v1174_v1  ;;  %v1195_v52 = vadd.f32 %v3886_v16, %v5431_v48  ;;  %v3921_v61 = vpop.f32.mrf.mxu0  ;;  %4092 = vmatprep.mubr.msk.bf16.mxu1 %vm727_vm3, %v4958_v5  ;;  %v2528_v5 = vrot.slane %v2527_v58, 4  ;;  %v2745_v50 = vsel %vm4963_vm7, %v2743_v4, %v2744_v25  ;;  %v6317_v63 = vld [vmem:[#allocation32_spill] sm:$0xff] }
 0x159   : > { %v1186_v0 = vpop.f32.mrf.mxu1  ;;  %v2523_v40 = vsel %vm4640_vm4, %v2518_v37, %v2522_v15 }
 0x15a   : > { %v5633_v20 = vadd.f32 %v3920_v6, %v1195_v52  ;;  %v1187_v7 = vadd.f32 %v1186_v0, %v5437_v45  ;;  %v1582_v12 = vpop.f32.mrf.mxu0  ;;  %v2742_v45 = vsel %vm4963_vm7, %v3613_v19, %v2741_v57  ;;  %v2533_v60 = vsel %vm4640_vm4, %v2528_v5, %v2532_v28  ;;  %v6323_v19 = vld [vmem:[#allocation30_spill] sm:$0xff] }
 0x15b   : > { %v3887_v41 = vpop.f32.mrf.mxu1  ;;  %v3596_v15 = vcombine.low %v2523_v40, %v2533_v60  ;;  %v6325_v5 = vld [vmem:[#allocation10_spill] sm:$0xff]  ;;  %v6327_v40 = vld [vmem:[#allocation13_spill] sm:$0xff] }
 0x15c   : > { %v5636_v55 = vadd.f32 %v1579_v13, %v1187_v7  ;;  %v1198_v48 = vadd.f32 %v3887_v41, %v5447_v22  ;;  %v3924_v51 = vpop.f32.mrf.mxu0  ;;  %4127 = vmatmul.mubr.msk.bf16.gmra.mxu0 %vm727_vm3, %v5209_v2 }
 0x15d   : > { %v1189_v21 = vpop.f32.mrf.mxu1  ;;  %4130 = vmatprep.mubr.msk.bf16.mxu0 %vm727_vm3, %v5288_v11  ;;  %v6319_v11 = vld [vmem:[#allocation27_spill] sm:$0xff] }
 0x15e   : > { %v5647_v10 = vadd.f32 %v3921_v61, %v1198_v48  ;;  %v1190_v22 = vadd.f32 %v1189_v21, %v5453_v49  ;;  %v1595_v27 = vpop.f32.mrf.mxu0  ;;  %v3615_v49 = vcombine.low %v2742_v45, %v2745_v50 }
 0x15f   : > { %v3890_v8 = vpop.f32.mrf.mxu1  ;;  %4093 = vmatmul.mubr.msk.bf16.gmra.mxu1 %vm727_vm3, %v6317_v63 }
 0x160   : > { %v5654_v44 = vadd.f32 %v1582_v12, %v1190_v22  ;;  %v1211_v53 = vadd.f32 %v3890_v8, %v6319_v11  ;;  %v3925_v18 = vpop.f32.mrf.mxu0  ;;  %4096 = vmatprep.mubr.msk.bf16.mxu1 %vm727_vm3, %v6320_v47  ;;  %v6324_v12 = vld [vmem:[#allocation15_spill] sm:$0xff] }
 0x161   : > { %v1202_v6 = vpop.f32.mrf.mxu1  ;;  %v6326_v22 = vld [vmem:[#allocation11_spill] sm:$0xff] }
 0x162   : > { %v5661_v57 = vadd.f32 %v3924_v51, %v1211_v53  ;;  %v1203_v33 = vadd.f32 %v1202_v6, %v6321_v29  ;;  %v1598_v1 = vpop.f32.mrf.mxu0 }
 0x163   : > { %v3891_v13 = vpop.f32.mrf.mxu1 }
 0x164   : > { %v5664_v16 = vadd.f32 %v1595_v27, %v1203_v33  ;;  %v1214_v52 = vadd.f32 %v3891_v13, %v6322_v17  ;;  %v3928_v61 = vpop.f32.mrf.mxu0  ;;  %4131 = vmatmul.mubr.msk.bf16.gmra.mxu0 %vm727_vm3, %v3615_v49 }
 0x165   : > { %v1205_v58 = vpop.f32.mrf.mxu1 }
 0x166   : > { %v5668_v31 = vadd.f32 %v3925_v18, %v1214_v52  ;;  %v1206_v0 = vadd.f32 %v1205_v58, %v6323_v19  ;;  %v1611_v4 = vpop.f32.mrf.mxu0 }
 0x167   : > { %v3894_v25 = vpop.f32.mrf.mxu1  ;;  %4097 = vmatmul.mubr.msk.bf16.gmra.mxu1 %vm727_vm3, %v3596_v15 }
 0x168   : > { %v5672_v7 = vadd.f32 %v1598_v1, %v1206_v0  ;;  %v1227_v41 = vadd.f32 %v3894_v25, %v6324_v12  ;;  %v3929_v37 = vpop.f32.mrf.mxu0 }
 0x169   : > { %v1218_v48 = vpop.f32.mrf.mxu1 }
 0x16a   : > { %v5675_v51 = vadd.f32 %v3928_v61, %v1227_v41  ;;  %v1219_v28 = vadd.f32 %v1218_v48, %v6325_v5  ;;  %v1614_v21 = vpop.f32.mrf.mxu0 }
 0x16b   : > { %v3895_v45 = vpop.f32.mrf.mxu1 }
 0x16c   : > { %v5678_v50 = vadd.f32 %v1611_v4, %v1219_v28  ;;  %v1230_v27 = vadd.f32 %v3895_v45, %v6326_v22  ;;  %v3968_v8 = vpop.f32.mrf.mxu0 }
 0x16d   : > { %v1221_v63 = vpop.f32.mrf.mxu1 }
 0x16e   : > { %v5681_v2 = vadd.f32 %v3929_v37, %v1230_v27  ;;  %v1222_v11 = vadd.f32 %v1221_v63, %v6327_v40  ;;  %v1933_v53 = vpop.f32.mrf.mxu0 }
 0x16f   : > { %v3934_v18 = vpop.f32.mrf.mxu1 }
 0x170   : > { %v5684_v47 = vadd.f32 %v1614_v21, %v1222_v11  ;;  %v1834_v60 = vadd.f32 %v3934_v18, %v5526_v54  ;;  %v3969_v49 = vpop.f32.mrf.mxu0 }
 0x171   : > { %v1705_v6 = vpop.f32.mrf.mxu1 }
 0x172   : > { %v5687_v29 = vadd.f32 %v3968_v8, %v1834_v60  ;;  %v1832_v33 = vadd.f32 %v1705_v6, %v5529_v32  ;;  %v1936_v1 = vpop.f32.mrf.mxu0 }
 0x173   : > { %v3935_v13 = vpop.f32.mrf.mxu1 }
 0x174   : > { %v5690_v15 = vadd.f32 %v1933_v53, %v1832_v33  ;;  %v1835_v17 = vadd.f32 %v3935_v13, %v5536_v46  ;;  %v3972_v52 = vpop.f32.mrf.mxu0 }
 0x175   : > { %v1708_v61 = vpop.f32.mrf.mxu1 }
 0x176   : > { %v5693_v58 = vadd.f32 %v3969_v49, %v1835_v17  ;;  %v1833_v19 = vadd.f32 %v1708_v61, %v5541_v38  ;;  %v1949_v0 = vpop.f32.mrf.mxu0 }
 0x177   : > { %v3938_v54 = vpop.f32.mrf.mxu1 }
 0x178   : > { %v5696_v4 = vadd.f32 %v1936_v1, %v1833_v19  ;;  %v1838_v25 = vadd.f32 %v3938_v54, %v5546_v3  ;;  %v3973_v12 = vpop.f32.mrf.mxu0 }
 0x179   : > { %v1721_v32 = vpop.f32.mrf.mxu1 }
 0x17a   : > { %v5699_v41 = vadd.f32 %v3972_v52, %v1838_v25  ;;  %v1836_v37 = vadd.f32 %v1721_v32, %v5549_v9  ;;  %v1952_v48 = vpop.f32.mrf.mxu0 }
 0x17b   : > { %v3939_v46 = vpop.f32.mrf.mxu1 }
 0x17c   : > { %v5702_v5 = vadd.f32 %v1949_v0, %v1836_v37  ;;  %v1839_v28 = vadd.f32 %v3939_v46, %v5556_v36  ;;  %v3976_v21 = vpop.f32.mrf.mxu0 }
 0x17d   : > { %v1724_v38 = vpop.f32.mrf.mxu1 }
 0x17e   : > { %v5705_v45 = vadd.f32 %v3973_v12, %v1839_v28  ;;  %v1837_v22 = vadd.f32 %v1724_v38, %v5561_v14  ;;  %v1965_v27 = vpop.f32.mrf.mxu0 }
 0x17f   : > { %v3942_v3 = vpop.f32.mrf.mxu1 }
 0x180   : > { %v5708_v8 = vadd.f32 %v1952_v48, %v1837_v22  ;;  %v1842_v63 = vadd.f32 %v3942_v3, %v5566_v42  ;;  %v3977_v40 = vpop.f32.mrf.mxu0 }
 0x181   : > { %v1737_v9 = vpop.f32.mrf.mxu1 }
 0x182   : > { %v5711_v11 = vadd.f32 %v3976_v21, %v1842_v63  ;;  %v1840_v53 = vadd.f32 %v1737_v9, %v5569_v24  ;;  %v1968_v18 = vpop.f32.mrf.mxu0 }
 0x183   : > { %v3943_v36 = vpop.f32.mrf.mxu1 }
 0x184   : > { %v5714_v60 = vadd.f32 %v1965_v27, %v1840_v53  ;;  %v1843_v49 = vadd.f32 %v3943_v36, %v5576_v26  ;;  %v3980_v6 = vpop.f32.mrf.mxu0 }
 0x185   : > { %v1740_v14 = vpop.f32.mrf.mxu1 }
 0x186   : > { %v5717_v33 = vadd.f32 %v3977_v40, %v1843_v49  ;;  %v1841_v1 = vadd.f32 %v1740_v14, %v5581_v30  ;;  %v1981_v13 = vpop.f32.mrf.mxu0 }
 0x187   : > { %v3946_v42 = vpop.f32.mrf.mxu1 }
 0x188   : > { %v5720_v17 = vadd.f32 %v1968_v18, %v1841_v1  ;;  %v1846_v52 = vadd.f32 %v3946_v42, %v5586_v62  ;;  %v3981_v61 = vpop.f32.mrf.mxu0 }
 0x189   : > { %v1753_v24 = vpop.f32.mrf.mxu1 }
 0x18a   : > { %v5723_v19 = vadd.f32 %v3980_v6, %v1846_v52  ;;  %v1844_v0 = vadd.f32 %v1753_v24, %v5589_v34  ;;  %v1984_v54 = vpop.f32.mrf.mxu0 }
 0x18b   : > { %v3947_v26 = vpop.f32.mrf.mxu1 }
 0x18c   : > { %v5726_v25 = vadd.f32 %v1981_v13, %v1844_v0  ;;  %v1847_v12 = vadd.f32 %v3947_v26, %v5596_v35  ;;  %v3984_v32 = vpop.f32.mrf.mxu0 }
 0x18d   : > { %v1756_v30 = vpop.f32.mrf.mxu1 }
 0x18e   : > { %v5729_v37 = vadd.f32 %v3981_v61, %v1847_v12  ;;  %v1845_v48 = vadd.f32 %v1756_v30, %v5605_v39  ;;  %v1997_v46 = vpop.f32.mrf.mxu0 }
 0x18f   : > { %v3950_v62 = vpop.f32.mrf.mxu1 }
 0x190   : > { %v5732_v28 = vadd.f32 %v1984_v54, %v1845_v48  ;;  %v1850_v21 = vadd.f32 %v3950_v62, %v5610_v23  ;;  %v3985_v38 = vpop.f32.mrf.mxu0 }
 0x191   : > { %v1769_v34 = vpop.f32.mrf.mxu1 }
 0x192   : > { %v5735_v22 = vadd.f32 %v3984_v32, %v1850_v21  ;;  %v1848_v27 = vadd.f32 %v1769_v34, %v5613_v56  ;;  %v2000_v3 = vpop.f32.mrf.mxu0 }
 0x193   : > { %v3951_v35 = vpop.f32.mrf.mxu1 }
 0x194   : > { %v5738_v63 = vadd.f32 %v1997_v46, %v1848_v27  ;;  %v1851_v40 = vadd.f32 %v3951_v35, %v5622_v43  ;;  %v3988_v9 = vpop.f32.mrf.mxu0 }
 0x195   : > { %v1772_v39 = vpop.f32.mrf.mxu1 }
 0x196   : > { %v5741_v53 = vadd.f32 %v3985_v38, %v1851_v40  ;;  %v1849_v18 = vadd.f32 %v1772_v39, %v5627_v59  ;;  %v2013_v36 = vpop.f32.mrf.mxu0 }
 0x197   : > { %v3954_v23 = vpop.f32.mrf.mxu1 }
 0x198   : > { %v5744_v49 = vadd.f32 %v2000_v3, %v1849_v18  ;;  %v1854_v6 = vadd.f32 %v3954_v23, %v5633_v20  ;;  %v3989_v14 = vpop.f32.mrf.mxu0 }
 0x199   : > { %v1785_v56 = vpop.f32.mrf.mxu1 }
 0x19a   : > { %v5747_v1 = vadd.f32 %v3988_v9, %v1854_v6  ;;  %v1852_v13 = vadd.f32 %v1785_v56, %v5636_v55  ;;  %v2016_v42 = vpop.f32.mrf.mxu0 }
 0x19b   : > { %v3955_v43 = vpop.f32.mrf.mxu1 }
 0x19c   : > { %v5750_v52 = vadd.f32 %v2013_v36, %v1852_v13  ;;  %v1855_v61 = vadd.f32 %v3955_v43, %v5647_v10  ;;  %v3992_v24 = vpop.f32.mrf.mxu0 }
 0x19d   : > { %v1788_v59 = vpop.f32.mrf.mxu1 }
 0x19e   : > { %v5753_v0 = vadd.f32 %v3989_v14, %v1855_v61  ;;  %v1853_v54 = vadd.f32 %v1788_v59, %v5654_v44  ;;  %v2029_v26 = vpop.f32.mrf.mxu0 }
 0x19f   : > { %v3958_v20 = vpop.f32.mrf.mxu1 }
 0x1a0   : > { %v5756_v12 = vadd.f32 %v2016_v42, %v1853_v54  ;;  %v1858_v32 = vadd.f32 %v3958_v20, %v5661_v57  ;;  %v3993_v30 = vpop.f32.mrf.mxu0 }
 0x1a1   : > { %v1801_v55 = vpop.f32.mrf.mxu1 }
 0x1a2   : > { %v5759_v48 = vadd.f32 %v3992_v24, %v1858_v32  ;;  %v1856_v46 = vadd.f32 %v1801_v55, %v5664_v16  ;;  %v2032_v62 = vpop.f32.mrf.mxu0 }
 0x1a3   : > { %v3959_v10 = vpop.f32.mrf.mxu1 }
 0x1a4   : > { %v5762_v21 = vadd.f32 %v2029_v26, %v1856_v46  ;;  %v1859_v38 = vadd.f32 %v3959_v10, %v5668_v31  ;;  %v3996_v34 = vpop.f32.mrf.mxu0 }
 0x1a5   : > { %v1804_v44 = vpop.f32.mrf.mxu1 }
 0x1a6   : > { %v5765_v27 = vadd.f32 %v3993_v30, %v1859_v38  ;;  %v1857_v3 = vadd.f32 %v1804_v44, %v5672_v7  ;;  %v2045_v35 = vpop.f32.mrf.mxu0 }
 0x1a7   : > { %v3962_v57 = vpop.f32.mrf.mxu1 }
 0x1a8   : > { %v5768_v40 = vadd.f32 %v2032_v62, %v1857_v3  ;;  %v1862_v9 = vadd.f32 %v3962_v57, %v5675_v51  ;;  %v3997_v39 = vpop.f32.mrf.mxu0 }
 0x1a9   : > { %v1817_v16 = vpop.f32.mrf.mxu1 }
 0x1aa   : > { %v5771_v18 = vadd.f32 %v3996_v34, %v1862_v9  ;;  %v1860_v36 = vadd.f32 %v1817_v16, %v5678_v50  ;;  %v2048_v23 = vpop.f32.mrf.mxu0 }
 0x1ab   : > { %v3963_v31 = vpop.f32.mrf.mxu1 }
 0x1ac   : > { %v5774_v6 = vadd.f32 %v2045_v35, %v1860_v36  ;;  %v1863_v14 = vadd.f32 %v3963_v31, %v5681_v2  ;;  %v4036_v56 = vpop.f32.mrf.mxu0 }
 0x1ad   : > { %v1820_v7 = vpop.f32.mrf.mxu1 }
 0x1ae   : > { %v5777_v13 = vadd.f32 %v3997_v39, %v1863_v14  ;;  %v1861_v42 = vadd.f32 %v1820_v7, %v5684_v47  ;;  %v2351_v43 = vpop.f32.mrf.mxu0 }
 0x1af   : > { %v4002_v51 = vpop.f32.mrf.mxu1 }
 0x1b0   : > { %v5780_v61 = vadd.f32 %v2048_v23, %v1861_v42  ;;  %v2274_v24 = vadd.f32 %v4002_v51, %v5687_v29  ;;  %v4037_v59 = vpop.f32.mrf.mxu0 }
 0x1b1   : > { %v2145_v50 = vpop.f32.mrf.mxu1 }
 0x1b2   : > { %v5783_v54 = vadd.f32 %v4036_v56, %v2274_v24  ;;  %v2272_v26 = vadd.f32 %v2145_v50, %v5690_v15  ;;  %v2354_v20 = vpop.f32.mrf.mxu0 }
 0x1b3   : > { %v4003_v2 = vpop.f32.mrf.mxu1 }
 0x1b4   : > { %v5786_v32 = vadd.f32 %v2351_v43, %v2272_v26  ;;  %v2275_v30 = vadd.f32 %v4003_v2, %v5693_v58  ;;  %v4040_v55 = vpop.f32.mrf.mxu0 }
 0x1b5   : > { %v2148_v47 = vpop.f32.mrf.mxu1 }
 0x1b6   : > { %v5789_v46 = vadd.f32 %v4037_v59, %v2275_v30  ;;  %v2273_v62 = vadd.f32 %v2148_v47, %v5696_v4  ;;  %v2367_v10 = vpop.f32.mrf.mxu0 }
 0x1b7   : > { %v4006_v29 = vpop.f32.mrf.mxu1 }
 0x1b8   : > { %v5792_v38 = vadd.f32 %v2354_v20, %v2273_v62  ;;  %v2278_v34 = vadd.f32 %v4006_v29, %v5699_v41  ;;  %v4041_v44 = vpop.f32.mrf.mxu0 }
 0x1b9   : > { %v2161_v15 = vpop.f32.mrf.mxu1 }
 0x1ba   : > { %v5795_v3 = vadd.f32 %v4040_v55, %v2278_v34  ;;  %v2276_v35 = vadd.f32 %v2161_v15, %v5702_v5  ;;  %v2370_v57 = vpop.f32.mrf.mxu0 }
 0x1bb   : > { %v4007_v58 = vpop.f32.mrf.mxu1 }
 0x1bc   : > { %v5798_v9 = vadd.f32 %v2367_v10, %v2276_v35  ;;  %v2279_v39 = vadd.f32 %v4007_v58, %v5705_v45  ;;  %v4044_v16 = vpop.f32.mrf.mxu0 }
 0x1bd   : > { %v2164_v4 = vpop.f32.mrf.mxu1 }
 0x1be   : > { %v5801_v36 = vadd.f32 %v4041_v44, %v2279_v39  ;;  %v2277_v23 = vadd.f32 %v2164_v4, %v5708_v8  ;;  %v2383_v31 = vpop.f32.mrf.mxu0 }
 0x1bf   : > { %v4010_v41 = vpop.f32.mrf.mxu1 }
 0x1c0   : > { %v5804_v14 = vadd.f32 %v2370_v57, %v2277_v23  ;;  %v2282_v56 = vadd.f32 %v4010_v41, %v5711_v11  ;;  %v4045_v7 = vpop.f32.mrf.mxu0 }
 0x1c1   : > { %v2177_v5 = vpop.f32.mrf.mxu1 }
 0x1c2   : > { %v5807_v42 = vadd.f32 %v4044_v16, %v2282_v56  ;;  %v2280_v43 = vadd.f32 %v2177_v5, %v5714_v60  ;;  %v2386_v51 = vpop.f32.mrf.mxu0 }
 0x1c3   : > { %v4011_v45 = vpop.f32.mrf.mxu1 }
 0x1c4   : > { %v5810_v24 = vadd.f32 %v2383_v31, %v2280_v43  ;;  %v2283_v59 = vadd.f32 %v4011_v45, %v5717_v33  ;;  %v4048_v50 = vpop.f32.mrf.mxu0 }
 0x1c5   : > { %v2180_v8 = vpop.f32.mrf.mxu1 }
 0x1c6   : > { %v5813_v26 = vadd.f32 %v4045_v7, %v2283_v59  ;;  %v2281_v20 = vadd.f32 %v2180_v8, %v5720_v17  ;;  %v2399_v2 = vpop.f32.mrf.mxu0 }
 0x1c7   : > { %v4014_v11 = vpop.f32.mrf.mxu1 }
 0x1c8   : > { %v5816_v30 = vadd.f32 %v2386_v51, %v2281_v20  ;;  %v2286_v55 = vadd.f32 %v4014_v11, %v5723_v19  ;;  %v4049_v47 = vpop.f32.mrf.mxu0 }
 0x1c9   : > { %v2193_v60 = vpop.f32.mrf.mxu1 }
 0x1ca   : > { %v5819_v62 = vadd.f32 %v4048_v50, %v2286_v55  ;;  %v2284_v10 = vadd.f32 %v2193_v60, %v5726_v25  ;;  %v2402_v29 = vpop.f32.mrf.mxu0 }
 0x1cb   : > { %v4015_v33 = vpop.f32.mrf.mxu1 }
 0x1cc   : > { %v5822_v34 = vadd.f32 %v2399_v2, %v2284_v10  ;;  %v2287_v44 = vadd.f32 %v4015_v33, %v5729_v37  ;;  %v4052_v15 = vpop.f32.mrf.mxu0 }
 0x1cd   : > { %v2196_v17 = vpop.f32.mrf.mxu1 }
 0x1ce   : > { %v5825_v35 = vadd.f32 %v4049_v47, %v2287_v44  ;;  %v2285_v57 = vadd.f32 %v2196_v17, %v5732_v28  ;;  %v2415_v58 = vpop.f32.mrf.mxu0 }
 0x1cf   : > { %v4018_v19 = vpop.f32.mrf.mxu1 }
 0x1d0   : > { %v5828_v39 = vadd.f32 %v2402_v29, %v2285_v57  ;;  %v2290_v16 = vadd.f32 %v4018_v19, %v5735_v22  ;;  %v4053_v4 = vpop.f32.mrf.mxu0 }
 0x1d1   : > { %v2209_v25 = vpop.f32.mrf.mxu1 }
 0x1d2   : > { %v5831_v23 = vadd.f32 %v4052_v15, %v2290_v16  ;;  %v2288_v31 = vadd.f32 %v2209_v25, %v5738_v63  ;;  %v2418_v41 = vpop.f32.mrf.mxu0 }
 0x1d3   : > { %v4019_v37 = vpop.f32.mrf.mxu1 }
 0x1d4   : > { %v5834_v56 = vadd.f32 %v2415_v58, %v2288_v31  ;;  %v2291_v7 = vadd.f32 %v4019_v37, %v5741_v53  ;;  %v4056_v5 = vpop.f32.mrf.mxu0 }
 0x1d5   : > { %v2212_v28 = vpop.f32.mrf.mxu1 }
 0x1d6   : > { %v5837_v43 = vadd.f32 %v4053_v4, %v2291_v7  ;;  %v2289_v51 = vadd.f32 %v2212_v28, %v5744_v49  ;;  %v2431_v45 = vpop.f32.mrf.mxu0 }
 0x1d7   : > { %v4022_v22 = vpop.f32.mrf.mxu1 }
 0x1d8   : > { %v5840_v59 = vadd.f32 %v2418_v41, %v2289_v51  ;;  %v2294_v50 = vadd.f32 %v4022_v22, %v5747_v1  ;;  %v4057_v8 = vpop.f32.mrf.mxu0 }
 0x1d9   : > { %v2225_v63 = vpop.f32.mrf.mxu1 }
 0x1da   : > { %v5843_v20 = vadd.f32 %v4056_v5, %v2294_v50  ;;  %v2292_v2 = vadd.f32 %v2225_v63, %v5750_v52  ;;  %v2434_v11 = vpop.f32.mrf.mxu0 }
 0x1db   : > { %v4023_v53 = vpop.f32.mrf.mxu1 }
 0x1dc   : > { %v5846_v55 = vadd.f32 %v2431_v45, %v2292_v2  ;;  %v2295_v47 = vadd.f32 %v4023_v53, %v5753_v0  ;;  %v4060_v60 = vpop.f32.mrf.mxu0 }
 0x1dd   : > { %v2228_v49 = vpop.f32.mrf.mxu1 }
 0x1de   : > { %v5849_v10 = vadd.f32 %v4057_v8, %v2295_v47  ;;  %v2293_v29 = vadd.f32 %v2228_v49, %v5756_v12  ;;  %v2447_v33 = vpop.f32.mrf.mxu0 }
 0x1df   : > { %v4026_v1 = vpop.f32.mrf.mxu1 }
 0x1e0   : > { %v5852_v44 = vadd.f32 %v2434_v11, %v2293_v29  ;;  %v2298_v15 = vadd.f32 %v4026_v1, %v5759_v48  ;;  %v4061_v17 = vpop.f32.mrf.mxu0 }
 0x1e1   : > { %v2241_v52 = vpop.f32.mrf.mxu1 }
 0x1e2   : > { %v5855_v57 = vadd.f32 %v4060_v60, %v2298_v15  ;;  %v2296_v58 = vadd.f32 %v2241_v52, %v5762_v21  ;;  %v2450_v19 = vpop.f32.mrf.mxu0 }
 0x1e3   : > { %v4027_v0 = vpop.f32.mrf.mxu1 }
 0x1e4   : > { %v5858_v16 = vadd.f32 %v2447_v33, %v2296_v58  ;;  %v2299_v4 = vadd.f32 %v4027_v0, %v5765_v27  ;;  %v4064_v25 = vpop.f32.mrf.mxu0 }
 0x1e5   : > { %v2244_v12 = vpop.f32.mrf.mxu1 }
 0x1e6   : > { %v5861_v31 = vadd.f32 %v4061_v17, %v2299_v4  ;;  %v2297_v41 = vadd.f32 %v2244_v12, %v5768_v40  ;;  %v2463_v37 = vpop.f32.mrf.mxu0 }
 0x1e7   : > { %v4030_v48 = vpop.f32.mrf.mxu1 }
 0x1e8   : > { %v5864_v7 = vadd.f32 %v2450_v19, %v2297_v41  ;;  %v2302_v5 = vadd.f32 %v4030_v48, %v5771_v18  ;;  %v5867_v28 = vpop.f32.mrf.mxu0 }
 0x1e9   : > { %v2257_v21 = vpop.f32.mrf.mxu1 }
 0x1ea   : > { %v5869_v51 = vadd.f32 %v4064_v25, %v2302_v5  ;;  %v2300_v45 = vadd.f32 %v2257_v21, %v5774_v6  ;;  %v5872_v27 = vpop.f32.mrf.mxu0 }
 0x1eb   : > { %v5874_v22 = vpop.f32.mrf.mxu1 }
 0x1ec   : > { %v5876_v50 = vadd.f32 %v2463_v37, %v2300_v45  ;;  %v4104_v40 = vpop.f32.mrf.mxu0 }
 0x1ed   : > { %v5878_v8 = vpop.f32.mrf.mxu1 }
 0x1ee   : > { %v2791_v63 = vpop.f32.mrf.mxu0 }
 0x1ef   : > { %v4070_v2 = vpop.f32.mrf.mxu1 }
 0x1f0   : > { %v2708_v18 = vadd.f32 %v4070_v2, %v5783_v54  ;;  %v4105_v11 = vpop.f32.mrf.mxu0 }
 0x1f1   : > { %v2579_v53 = vpop.f32.mrf.mxu1 }
 0x1f2   : > { %v5881_v47 = vadd.f32 %v4104_v40, %v2708_v18  ;;  %v2706_v60 = vadd.f32 %v2579_v53, %v5786_v32  ;;  %v2794_v6 = vpop.f32.mrf.mxu0 }
 0x1f3   : > { %v4071_v49 = vpop.f32.mrf.mxu1 }
 0x1f4   : > { %v5884_v29 = vadd.f32 %v2791_v63, %v2706_v60  ;;  %v2709_v33 = vadd.f32 %v4071_v49, %v5789_v46  ;;  %v4108_v1 = vpop.f32.mrf.mxu0 }
 0x1f5   : > { %v2582_v15 = vpop.f32.mrf.mxu1 }
 0x1f6   : > { %v5887_v17 = vadd.f32 %v4105_v11, %v2709_v33  ;;  %v2707_v52 = vadd.f32 %v2582_v15, %v5792_v38  ;;  %v2807_v58 = vpop.f32.mrf.mxu0 }
 0x1f7   : > { %v4074_v54 = vpop.f32.mrf.mxu1 }
 0x1f8   : > { %v5890_v19 = vadd.f32 %v2794_v6, %v2707_v52  ;;  %v2712_v0 = vadd.f32 %v4074_v54, %v5795_v3  ;;  %v4109_v4 = vpop.f32.mrf.mxu0 }
 0x1f9   : > { %v2595_v32 = vpop.f32.mrf.mxu1 }
 0x1fa   : > { %v5893_v25 = vadd.f32 %v4108_v1, %v2712_v0  ;;  %v2710_v12 = vadd.f32 %v2595_v32, %v5798_v9  ;;  %v2810_v41 = vpop.f32.mrf.mxu0 }
 0x1fb   : > { %v4075_v46 = vpop.f32.mrf.mxu1 }
 0x1fc   : > { %v5896_v37 = vadd.f32 %v2807_v58, %v2710_v12  ;;  %v2713_v48 = vadd.f32 %v4075_v46, %v5801_v36  ;;  %v4112_v5 = vpop.f32.mrf.mxu0 }
 0x1fd   : > { %v2598_v38 = vpop.f32.mrf.mxu1 }
 0x1fe   : > { %v5899_v21 = vadd.f32 %v4109_v4, %v2713_v48  ;;  %v2711_v45 = vadd.f32 %v2598_v38, %v5804_v14  ;;  %v2823_v40 = vpop.f32.mrf.mxu0 }
 0x1ff   : > { %v4078_v3 = vpop.f32.mrf.mxu1 }
 0x200   : > { %v5902_v63 = vadd.f32 %v2810_v41, %v2711_v45  ;;  %v2716_v2 = vadd.f32 %v4078_v3, %v5807_v42  ;;  %v4113_v18 = vpop.f32.mrf.mxu0 }
 0x201   : > { %v2611_v9 = vpop.f32.mrf.mxu1 }
 0x202   : > { %v5905_v11 = vadd.f32 %v4112_v5, %v2716_v2  ;;  %v2714_v53 = vadd.f32 %v2611_v9, %v5810_v24  ;;  %v2826_v60 = vpop.f32.mrf.mxu0 }
 0x203   : > { %v4079_v36 = vpop.f32.mrf.mxu1 }
 0x204   : > { %v5908_v6 = vadd.f32 %v2823_v40, %v2714_v53  ;;  %v2717_v49 = vadd.f32 %v4079_v36, %v5813_v26  ;;  %v4116_v33 = vpop.f32.mrf.mxu0 }
 0x205   : > { %v2614_v14 = vpop.f32.mrf.mxu1 }
 0x206   : > { %v5911_v1 = vadd.f32 %v4113_v18, %v2717_v49  ;;  %v2715_v15 = vadd.f32 %v2614_v14, %v5816_v30  ;;  %v2839_v52 = vpop.f32.mrf.mxu0 }
 0x207   : > { %v4082_v42 = vpop.f32.mrf.mxu1 }
 0x208   : > { %v5914_v58 = vadd.f32 %v2826_v60, %v2715_v15  ;;  %v2720_v54 = vadd.f32 %v4082_v42, %v5819_v62  ;;  %v4117_v0 = vpop.f32.mrf.mxu0 }
 0x209   : > { %v2627_v24 = vpop.f32.mrf.mxu1 }
 0x20a   : > { %v5917_v4 = vadd.f32 %v4116_v33, %v2720_v54  ;;  %v2718_v32 = vadd.f32 %v2627_v24, %v5822_v34  ;;  %v2842_v12 = vpop.f32.mrf.mxu0 }
 0x20b   : > { %v4083_v26 = vpop.f32.mrf.mxu1 }
 0x20c   : > { %v5920_v41 = vadd.f32 %v2839_v52, %v2718_v32  ;;  %v2721_v46 = vadd.f32 %v4083_v26, %v5825_v35  ;;  %v4120_v48 = vpop.f32.mrf.mxu0 }
 0x20d   : > { %v2630_v30 = vpop.f32.mrf.mxu1 }
 0x20e   : > { %v5923_v5 = vadd.f32 %v4117_v0, %v2721_v46  ;;  %v2719_v38 = vadd.f32 %v2630_v30, %v5828_v39  ;;  %v2855_v45 = vpop.f32.mrf.mxu0 }
 0x20f   : > { %v4086_v62 = vpop.f32.mrf.mxu1 }
 0x210   : > { %v5926_v40 = vadd.f32 %v2842_v12, %v2719_v38  ;;  %v2724_v3 = vadd.f32 %v4086_v62, %v5831_v23  ;;  %v4121_v2 = vpop.f32.mrf.mxu0 }
 0x211   : > { %v2643_v34 = vpop.f32.mrf.mxu1 }
 0x212   : > { %v5929_v18 = vadd.f32 %v4120_v48, %v2724_v3  ;;  %v2722_v9 = vadd.f32 %v2643_v34, %v5834_v56  ;;  %v2858_v53 = vpop.f32.mrf.mxu0 }
 0x213   : > { %v4087_v35 = vpop.f32.mrf.mxu1 }
 0x214   : > { %v5932_v60 = vadd.f32 %v2855_v45, %v2722_v9  ;;  %v2725_v36 = vadd.f32 %v4087_v35, %v5837_v43  ;;  %v4124_v49 = vpop.f32.mrf.mxu0 }
 0x215   : > { %v2646_v39 = vpop.f32.mrf.mxu1 }
 0x216   : > { %v5935_v33 = vadd.f32 %v4121_v2, %v2725_v36  ;;  %v2723_v14 = vadd.f32 %v2646_v39, %v5840_v59  ;;  %v2871_v15 = vpop.f32.mrf.mxu0 }
 0x217   : > { %v4090_v23 = vpop.f32.mrf.mxu1 }
 0x218   : > { %v5938_v52 = vadd.f32 %v2858_v53, %v2723_v14  ;;  %v2728_v42 = vadd.f32 %v4090_v23, %v5843_v20  ;;  %v4125_v54 = vpop.f32.mrf.mxu0 }
 0x219   : > { %v2659_v56 = vpop.f32.mrf.mxu1 }
 0x21a   : > { %v5941_v0 = vadd.f32 %v4124_v49, %v2728_v42  ;;  %v2726_v24 = vadd.f32 %v2659_v56, %v5846_v55  ;;  %v2874_v32 = vpop.f32.mrf.mxu0  ;;  %v2303_v49 = vadd.f32 %v5874_v22, %v5777_v13 }
 0x21b   : > { %v4091_v43 = vpop.f32.mrf.mxu1 }
 0x21c   : > { %v5944_v12 = vadd.f32 %v2871_v15, %v2726_v24  ;;  %v2729_v26 = vadd.f32 %v4091_v43, %v5849_v10  ;;  %v4128_v46 = vpop.f32.mrf.mxu0 }
 0x21d   : > { %v2662_v59 = vpop.f32.mrf.mxu1 }
 0x21e   : > { %v5947_v48 = vadd.f32 %v4125_v54, %v2729_v26  ;;  %v2727_v30 = vadd.f32 %v2662_v59, %v5852_v44  ;;  %v2887_v38 = vpop.f32.mrf.mxu0  ;;  %v2509_v54 = vadd.f32 %v5867_v28, %v2303_v49 }
 0x21f   : > { %v4094_v20 = vpop.f32.mrf.mxu1 }
 0x220   : > { %v5950_v45 = vadd.f32 %v2874_v32, %v2727_v30  ;;  %v2732_v62 = vadd.f32 %v4094_v20, %v5855_v57  ;;  %v4129_v3 = vpop.f32.mrf.mxu0 }
 0x221   : > { %v2675_v55 = vpop.f32.mrf.mxu1 }
 0x222   : > { %v5953_v2 = vadd.f32 %v4128_v46, %v2732_v62  ;;  %v2730_v34 = vadd.f32 %v2675_v55, %v5858_v16  ;;  %v2890_v9 = vpop.f32.mrf.mxu0  ;;  %v2301_v16 = vadd.f32 %v5878_v8, %v5780_v61 }
 0x223   : > { %v4095_v10 = vpop.f32.mrf.mxu1 }
 0x224   : > { %v5956_v53 = vadd.f32 %v2887_v38, %v2730_v34  ;;  %v2733_v35 = vadd.f32 %v4095_v10, %v5861_v31  ;;  %v4132_v36 = vpop.f32.mrf.mxu0 }
 0x225   : > { %v2678_v44 = vpop.f32.mrf.mxu1 }
 0x226   : > { %v5961_v39 = vadd.f32 %v4129_v3, %v2733_v35  ;;  %v2731_v57 = vadd.f32 %v2678_v44, %v5864_v7  ;;  %v2903_v15 = vpop.f32.mrf.mxu0  ;;  %v2507_v7 = vadd.f32 %v5872_v27, %v2301_v16 }
 0x227   : > { %v4098_v14 = vpop.f32.mrf.mxu1 }
 0x228   : > { %v5966_v23 = vadd.f32 %v2890_v9, %v2731_v57  ;;  %v2736_v42 = vadd.f32 %v4098_v14, %v5869_v51  ;;  %v4133_v24 = vpop.f32.mrf.mxu0 }
 0x229   : > { %v2691_v31 = vpop.f32.mrf.mxu1 }
 0x22a   : > { %v5970_v56 = vadd.f32 %v4132_v36, %v2736_v42  ;;  %v2734_v13 = vadd.f32 %v2691_v31, %v5876_v50  ;;  %v2906_v46 = vpop.f32.mrf.mxu0 }
 0x22b   : > { %v4099_v22 = vpop.f32.mrf.mxu1 }
 0x22c   : > { %v5974_v32 = vadd.f32 %v2903_v15, %v2734_v13  ;;  %v2737_v43 = vadd.f32 %v4099_v22, %v2509_v54  ;;  %2953 = sbr.rel (%p3632_p12) target bundleno = 563 (0x233), region = 32 }
 0x22d   : > { %v2694_v61 = vpop.f32.mrf.mxu1 }
 0x22e   : > { %v5976_v8 = vadd.f32 %v4133_v24, %v2737_v43  ;;  %v2735_v26 = vadd.f32 %v2694_v61, %v2507_v7 }
 0x230   : > { %v5978_v51 = vadd.f32 %v2906_v46, %v2735_v26 }
 0x231   : > { %v4479_v28 = vmov 0.0  }
 0x232   : > { %2954 = vst [vmem:[#allocation4] sm:$0x1] %v4479_v28  ;;  %2955 = vst [vmem:[#allocation6] sm:$0x1] %v4479_v28 }
 0x233 PF: > { %v4237_v27 = vpack.i.bf16 %v5932_v60, %v5884_v29  ;;  %v4239_v50 = vpack.i.bf16 %v5938_v52, %v5890_v19  ;;  %v2957_v59 = vadd.f32 %v5890_v19, %v5884_v29  ;;  %v2997_v30 = vmul.f32 %v5884_v29, %v5884_v29  ;;  %s4480_s7 = smov [#allocation4]   ;;  %s4481_s27 = smov [#allocation6]  }
 0x234   : > { %v2998_v38 = vmul.f32 %v5890_v19, %v5890_v19  ;;  %v2999_v20 = vmul.f32 %v5881_v47, %v5881_v47  ;;  %v4241_v62 = vpack.i.bf16 %v5929_v18, %v5881_v47  ;;  %v3000_v55 = vmul.f32 %v5887_v17, %v5887_v17  ;;  %s3277_s24 = sshll.u32 %s4480_s7, 4  ;;  %s3290_s30 = sshll.u32 %s4481_s27, 4  ;;  %s3278_s24 = int_to_ptr.vmem [resolvable:$true] %s3277_s24  ;;  %s3291_s30 = int_to_ptr.vmem [resolvable:$true] %s3290_s30 }
 0x235   : > { %4238 = vxpose.xlu0.b32.start [1/16] %v4237_v27, 128  ;;  %v2958_v3 = vadd.f32 %v2957_v59, %v5881_v47  ;;  %v3001_v29 = vmul.f32 %v5896_v37, %v5896_v37  ;;  %v4243_v19 = vpack.i.bf16 %v5935_v33, %v5887_v17  ;;  %v3002_v36 = vmul.f32 %v5902_v63, %v5902_v63  ;;  %s4349_s5 = scalar_lea.vmem %s3278_s24, 16  ;;  %s4355_s8 = scalar_lea.vmem %s3278_s24, 32 }
 0x236   : > { %v3029_v34 = vadd.f32 %v2998_v38, %v2997_v30  ;;  %v3003_v49 = vmul.f32 %v5893_v25, %v5893_v25  ;;  %v4245_v14 = vpack.i.bf16 %v5944_v12, %v5896_v37  ;;  %v3005_v31 = vmul.f32 %v5908_v6, %v5908_v6  ;;  %p4350_p13 = scmp.ne.s32.totalorder %s3278_s24, %s4349_s5  ;;  %p4356_p3 = scmp.lt.s32.totalorder %s3278_s24, %s3278_s24 }
 0x237   : > { %v2959_v9 = vadd.f32 %v2958_v3, %v5887_v17  ;;  %v3004_v17 = vmul.f32 %v5899_v21, %v5899_v21  ;;  %v4247_v13 = vpack.i.bf16 %v5950_v45, %v5902_v63  ;;  %v3007_v43 = vmul.f32 %v5905_v11, %v5905_v11  ;;  %p4357_p5 = scmp.lt.s32.totalorder %s4355_s8, %s4349_s5 }
 0x238   : > { %v3030_v10 = vadd.f32 %v3029_v34, %v2999_v20  ;;  %v4249_v26 = vpack.i.bf16 %v5941_v0, %v5893_v25  ;;  %v4251_v30 = vpack.i.bf16 %v5947_v48, %v5899_v21  ;;  %v3011_v3 = vmul.f32 %v5917_v4, %v5917_v4  ;;  %p4351_p0 = pnand %p4350_p13, %p4546_p2 }
 0x239   : > { %4240 = vxpose.xlu0.b32.cont [2/16] %v4239_v50, 128  ;;  %v2960_v35 = vadd.f32 %v2959_v9, %v5896_v37  ;;  %v3006_v37 = vmul.f32 %v5914_v58, %v5914_v58  ;;  %v3009_v50 = vmul.f32 %v5920_v41, %v5920_v41  ;;  %v4253_v34 = vpack.i.bf16 %v5956_v53, %v5908_v6  ;;  %p4358_p6 = por %p4357_p5, %p4356_p3 }
 0x23a   : > { %v3031_v47 = vadd.f32 %v3030_v10, %v3000_v55  ;;  %p4352_p1 = pneg %p4351_p0 }
 0x23b   : > { %v2961_v44 = vadd.f32 %v2960_v35, %v5902_v63  ;;  %v3008_v63 = vmul.f32 %v5911_v1, %v5911_v1 }
 0x23c   : > { %v3032_v57 = vadd.f32 %v3031_v47, %v3001_v29  ;;  %p4359_p7 = pnand %p4358_p6, %p4352_p1 }
 0x23d   : > { %4242 = vxpose.xlu0.b32.cont [3/16] %v4241_v62, 128  ;;  %v2962_v15 = vadd.f32 %v2961_v44, %v5893_v25  ;;  %v3010_v25 = vmul.f32 %v5926_v40, %v5926_v40 }
 0x23e   : > { %v3033_v16 = vadd.f32 %v3032_v57, %v3002_v36  ;;  %v4255_v36 = vpack.i.bf16 %v5966_v23, %v5914_v58  ;;  %v3015_v57 = vmul.f32 %v5929_v18, %v5929_v18 }
 0x23f   : > { %v2963_v42 = vadd.f32 %v2962_v15, %v5899_v21  ;;  %v3012_v21 = vmul.f32 %v5923_v5, %v5923_v5  ;;  %v4257_v15 = vpack.i.bf16 %v5953_v2, %v5905_v11 }
 0x240   : > { %v3034_v54 = vadd.f32 %v3033_v16, %v3003_v49 }
 0x241   : > { %4244 = vxpose.xlu0.b32.cont [4/16] %v4243_v19, 128  ;;  %v2964_v22 = vadd.f32 %v2963_v42, %v5908_v6  ;;  %v3013_v19 = vmul.f32 %v5932_v60, %v5932_v60  ;;  %v3014_v6 = vmul.f32 %v5938_v52, %v5938_v52  ;;  %v3017_v42 = vmul.f32 %v5944_v12, %v5944_v12 }
 0x242   : > { %v3035_v24 = vadd.f32 %v3034_v54, %v3004_v17 }
 0x243   : > { %v2965_v7 = vadd.f32 %v2964_v22, %v5914_v58  ;;  %v3016_v58 = vmul.f32 %v5935_v33, %v5935_v33  ;;  %v3019_v22 = vmul.f32 %v5941_v0, %v5941_v0 }
 0x244   : > { %v3036_v61 = vadd.f32 %v3035_v24, %v3005_v31  ;;  %v4259_v31 = vpack.i.bf16 %v5961_v39, %v5911_v1 }
 0x245   : > { %4246 = vxpose.xlu0.b32.cont [5/16] %v4245_v14, 128  ;;  %v2966_v46 = vadd.f32 %v2965_v7, %v5905_v11  ;;  %v3018_v11 = vmul.f32 %v5950_v45, %v5950_v45 }
 0x246   : > { %v3037_v28 = vadd.f32 %v3036_v61, %v3006_v37  ;;  %v4261_v37 = vpack.i.bf16 %v5974_v32, %v5920_v41  ;;  %v4263_v61 = vpack.i.bf16 %v5978_v51, %v5926_v40 }
 0x247   : > { %v2967_v27 = vadd.f32 %v2966_v46, %v5911_v1  ;;  %v3020_v1 = vmul.f32 %v5947_v48, %v5947_v48 }
 0x248   : > { %v3038_v59 = vadd.f32 %v3037_v28, %v3007_v43  ;;  %v3021_v43 = vmul.f32 %v5956_v53, %v5956_v53  ;;  %v4265_v28 = vpack.i.bf16 %v5970_v56, %v5917_v4 }
 0x249   : > { %4248 = vxpose.xlu0.b32.cont [6/16] %v4247_v13, 128  ;;  %v2968_v38 = vadd.f32 %v2967_v27, %v5920_v41  ;;  %v3022_v41 = vmul.f32 %v5966_v23, %v5966_v23 }
 0x24a   : > { %v3039_v20 = vadd.f32 %v3038_v59, %v3008_v63  ;;  %v3023_v63 = vmul.f32 %v5953_v2, %v5953_v2  ;;  %v3025_v59 = vmul.f32 %v5974_v32, %v5974_v32 }
 0x24b   : > { %v2969_v62 = vadd.f32 %v2968_v38, %v5926_v40  ;;  %v3024_v40 = vmul.f32 %v5961_v39, %v5961_v39 }
 0x24c   : > { %v3040_v55 = vadd.f32 %v3039_v20, %v3009_v50  ;;  %v3027_v20 = vmul.f32 %v5970_v56, %v5970_v56 }
 0x24d   : > { %4250 = vxpose.xlu0.b32.cont [7/16] %v4249_v26, 128  ;;  %v2970_v9 = vadd.f32 %v2969_v62, %v5917_v4  ;;  %v3026_v4 = vmul.f32 %v5978_v51, %v5978_v51 }
 0x24e   : > { %v3041_v29 = vadd.f32 %v3040_v55, %v3010_v25 }
 0x24f   : > { %v2971_v10 = vadd.f32 %v2970_v9, %v5923_v5 }
 0x250   : > { %v3042_v35 = vadd.f32 %v3041_v29, %v3011_v3  ;;  %v3028_v3 = vmul.f32 %v5976_v8, %v5976_v8 }
 0x251   : > { %4252 = vxpose.xlu0.b32.cont [8/16] %v4251_v30, 128  ;;  %v2972_v47 = vadd.f32 %v2971_v10, %v5932_v60  ;;  %v4267_v30 = vpack.i.bf16 %v5976_v8, %v5923_v5 }
 0x252   : > { %v3043_v44 = vadd.f32 %v3042_v35, %v3012_v21 }
 0x253   : > { %v2973_v49 = vadd.f32 %v2972_v47, %v5938_v52  ;;  %v2956_v47 = vld [vmem:[#allocation4] sm:$0x1] }
 0x254   : > { %v3044_v14 = vadd.f32 %v3043_v44, %v3013_v19 }
 0x255   : > { %4254 = vxpose.xlu0.b32.cont [9/16] %v4253_v34, 128  ;;  %v2974_v17 = vadd.f32 %v2973_v49, %v5929_v18  ;;  %v2996_v49 = vld [vmem:[#allocation6] sm:$0x1] }
 0x256   : > { %v3045_v60 = vadd.f32 %v3044_v14, %v3014_v6 }
 0x257   : > { %v2975_v16 = vadd.f32 %v2974_v17, %v5935_v33 }
 0x258   : > { %v3046_v52 = vadd.f32 %v3045_v60, %v3015_v57 }
 0x259   : > { %4256 = vxpose.xlu0.b32.cont [10/16] %v4255_v36, 128  ;;  %v2976_v54 = vadd.f32 %v2975_v16, %v5944_v12 }
 0x25a   : > { %v3047_v18 = vadd.f32 %v3046_v52, %v3016_v58 }
 0x25b   : > { %v2977_v13 = vadd.f32 %v2976_v54, %v5950_v45 }
 0x25c   : > { %v3048_v33 = vadd.f32 %v3047_v18, %v3017_v42 }
 0x25d   : > { %4258 = vxpose.xlu0.b32.cont [11/16] %v4257_v15, 128  ;;  %v2978_v24 = vadd.f32 %v2977_v13, %v5941_v0 }
 0x25e   : > { %v3049_v12 = vadd.f32 %v3048_v33, %v3018_v11 }
 0x25f   : > { %v2979_v7 = vadd.f32 %v2978_v24, %v5947_v48 }
 0x260   : > { %v3050_v45 = vadd.f32 %v3049_v12, %v3019_v22 }
 0x261   : > { %4260 = vxpose.xlu0.b32.cont [12/16] %v4259_v31, 128  ;;  %v2980_v26 = vadd.f32 %v2979_v7, %v5956_v53 }
 0x262   : > { %v3051_v0 = vadd.f32 %v3050_v45, %v3020_v1 }
 0x263   : > { %v2981_v46 = vadd.f32 %v2980_v26, %v5966_v23 }
 0x264   : > { %v3052_v48 = vadd.f32 %v3051_v0, %v3021_v43 }
 0x265   : > { %4262 = vxpose.xlu0.b32.cont [13/16] %v4261_v37, 128  ;;  %v2982_v27 = vadd.f32 %v2981_v46, %v5953_v2 }
 0x266   : > { %v3053_v53 = vadd.f32 %v3052_v48, %v3022_v41 }
 0x267   : > { %v2983_v50 = vadd.f32 %v2982_v27, %v5961_v39 }
 0x268   : > { %v3054_v23 = vadd.f32 %v3053_v53, %v3023_v63 }
 0x269   : > { %4264 = vxpose.xlu0.b32.cont [14/16] %v4263_v61, 128  ;;  %v2984_v38 = vadd.f32 %v2983_v50, %v5974_v32 }
 0x26a   : > { %v3055_v2 = vadd.f32 %v3054_v23, %v3024_v40 }
 0x26b   : > { %v2985_v25 = vadd.f32 %v2984_v38, %v5978_v51 }
 0x26c   : > { %v3056_v39 = vadd.f32 %v3055_v2, %v3025_v59 }
 0x26d   : > { %4266 = vxpose.xlu0.b32.cont [15/16] %v4265_v28, 128  ;;  %v2986_v62 = vadd.f32 %v2985_v25, %v5970_v56 }
 0x26e   : > { %v3057_v55 = vadd.f32 %v3056_v39, %v3026_v4 }
 0x26f   : > { %v2987_v5 = vadd.f32 %v2986_v62, %v5976_v8 }
 0x270   : > { %v3058_v32 = vadd.f32 %v3057_v55, %v3027_v20 }
 0x271   : > { %4268 = vxpose.xlu0.b32.end [16/16] %v4267_v30, 128  ;;  %v2988_v34 = vrot.slane %v2987_v5, 4 }
 0x272   : > { %v3059_v9 = vadd.f32 %v3058_v32, %v3028_v3 }
 0x273   : > { %v2989_v21 = vadd.f32 %v2988_v34, %v2987_v5 }
 0x274   : > { %v3060_v29 = vrot.slane %v3059_v9, 4 }
 0x275   : > { %v2990_v10 = vrot.slane %v2989_v21, 2 }
 0x276   : > { %v3061_v51 = vadd.f32 %v3060_v29, %v3059_v9 }
 0x277   : > { %v2991_v19 = vadd.f32 %v2990_v10, %v2989_v21 }
 0x278   : > { %v3062_v35 = vrot.slane %v3061_v51, 2 }
 0x279   : > { %v2992_v36 = vrot.slane %v2991_v19, 1 }
 0x27a   : > { %v3063_v56 = vadd.f32 %v3062_v35, %v3061_v51 }
 0x27b   : > { %v2993_v6 = vadd.f32 %v2992_v36, %v2991_v19 }
 0x27c   : > { %v3064_v44 = vrot.slane %v3063_v56, 1 }
 0x27d   : > { %v2994_v8 = vadd.f32 %v2993_v6, %v2956_v47 }
 0x27e   : > { %v3065_v57 = vadd.f32 %v3064_v44, %v3063_v56 }
 0x27f   : > { %2995 = vst [vmem:[#allocation4] sm:$0x1] %v2994_v8 }
 0x280   : > { %4362 = shalt.err (!%p4359_p7)
}
 0x281   : > { %4149 = dma.vmem_to_hbm [thread:$0]  (%p4546_p2), %s3278_s24, 16, %s6205_s3, [#allocation5]   ;;  %v3066_v14 = vadd.f32 %v3065_v57, %v2996_v49 }
 0x282   : > { %s4373_s11 = scalar_lea.vmem %s3291_s30, 16  ;;  %s4379_s12 = scalar_lea.vmem %s3291_s30, 32 }
 0x283   : > { %3067 = vst [vmem:[#allocation6] sm:$0x1] %v3066_v14  ;;  %p4374_p9 = scmp.ne.s32.totalorder %s3291_s30, %s4373_s11  ;;  %p4380_p12 = scmp.lt.s32.totalorder %s3291_s30, %s3291_s30 }
 0x284   : > { %p4381_p13 = scmp.lt.s32.totalorder %s4379_s12, %s4373_s11 }
 0x285   : > { %p4375_p10 = pnand %p4374_p9, %p4546_p2 }
 0x286   : > { %p4382_p0 = por %p4381_p13, %p4380_p12 }
 0x287   : > { %p4376_p11 = pneg %p4375_p10 }
 0x289   : > { %p4383_p1 = pnand %p4382_p0, %p4376_p11 }
 0x28b   : > { %4386 = shalt.err (!%p4383_p1)
}
 0x28c   : > { %4151 = dma.vmem_to_hbm [thread:$0]  (%p4546_p2), %s3291_s30, 16, %s6206_s4, [#allocation5]  }
 0x28d   : > { %s3674_s21 = sshll.u32 %s4469_s18, 11  ;;  %s3261_s7 = sshll.u32 %s5981_s22, 4  ;;  %s6148_s7 = int_to_ptr.vmem [resolvable:$true] %s3261_s7 }
 0x28e   : > { %s6146_s30 = scalar_lea.hbm %s6204_s2, %s3674_s21  ;;  %s6153_s5 = scalar_lea.sflag [#allocation3], %s217_s6 }
 0x28f   : > { %s4397_s18 = scalar_lea.vmem %s6148_s7, 2048  ;;  %s4482_s8 = smov [#allocation2]  }
 0x290   : > { %p4398_p3 = scmp.ne.s32.totalorder %s6148_s7, %s4397_s18  ;;  %s4401_s9 = sshll.u32 %s4482_s8, 4  ;;  %s4402_s9 = int_to_ptr.vmem [resolvable:$false] %s4401_s9 }
 0x291   : > { %s4403_s10 = scalar_lea.vmem %s4402_s9, 4096  ;;  %p4404_p7 = scmp.lt.s32.totalorder %s6148_s7, %s4402_s9 }
 0x292   : > { %p4399_p5 = pnand %p4398_p3, %p4556_p4  ;;  %p4405_p9 = scmp.lt.s32.totalorder %s4403_s10, %s4397_s18 }
 0x294   : > { %p4400_p6 = pneg %p4399_p5  ;;  %p4406_p10 = por %p4405_p9, %p4404_p7 }
 0x296   : > { %p4407_p11 = pnand %p4406_p10, %p4400_p6 }
 0x2b1   : > { %v4269_v15 = vpop.trf.xlu0 }
 0x2b2   : > { %v4273_v17 = vunpack.i.h.bf16 %v4269_v15  ;;  %v4270_v58 = vunpack.i.l.bf16 %v4269_v15 }
 0x2b4   : > { %v3658_v60 = vpack.c.bf16 %v4273_v17, %v4270_v58 }
 0x2b5   : > { %v4274_v16 = vpop.trf.xlu0 }
 0x2b6   : > { %3228 = vst [vmem:[%s5981_s22] sm:$0xff] %v3658_v60  ;;  %v4278_v42 = vunpack.i.h.bf16 %v4274_v16  ;;  %v4275_v52 = vunpack.i.l.bf16 %v4274_v16 }
 0x2b8   : > { %v3659_v31 = vpack.c.bf16 %v4278_v42, %v4275_v52 }
 0x2b9   : > { %v4279_v54 = vpop.trf.xlu0 }
 0x2ba   : > { %3229 = vst [vmem:[%s5981_s22 + $0x8] sm:$0xff] %v3659_v31  ;;  %v4283_v11 = vunpack.i.h.bf16 %v4279_v54  ;;  %v4280_v18 = vunpack.i.l.bf16 %v4279_v54 }
 0x2bc   : > { %v3660_v13 = vpack.c.bf16 %v4283_v11, %v4280_v18 }
 0x2bd   : > { %v4284_v22 = vpop.trf.xlu0 }
 0x2be   : > { %3230 = vst [vmem:[%s5981_s22 + $0x10] sm:$0xff] %v3660_v13  ;;  %v4288_v33 = vunpack.i.h.bf16 %v4284_v22  ;;  %v4285_v37 = vunpack.i.l.bf16 %v4284_v22 }
 0x2c0   : > { %v3661_v24 = vpack.c.bf16 %v4288_v33, %v4285_v37 }
 0x2c1   : > { %v4289_v1 = vpop.trf.xlu0 }
 0x2c2   : > { %3231 = vst [vmem:[%s5981_s22 + $0x18] sm:$0xff] %v3661_v24  ;;  %v4293_v12 = vunpack.i.h.bf16 %v4289_v1  ;;  %v4290_v7 = vunpack.i.l.bf16 %v4289_v1 }
 0x2c4   : > { %v3662_v43 = vpack.c.bf16 %v4293_v12, %v4290_v7 }
 0x2c5   : > { %v4294_v45 = vpop.trf.xlu0 }
 0x2c6   : > { %3232 = vst [vmem:[%s5981_s22 + $0x20] sm:$0xff] %v3662_v43  ;;  %v4298_v61 = vunpack.i.h.bf16 %v4294_v45  ;;  %v4295_v26 = vunpack.i.l.bf16 %v4294_v45 }
 0x2c8   : > { %v3663_v41 = vpack.c.bf16 %v4298_v61, %v4295_v26 }
 0x2c9   : > { %v4299_v0 = vpop.trf.xlu0 }
 0x2ca   : > { %3233 = vst [vmem:[%s5981_s22 + $0x28] sm:$0xff] %v3663_v41  ;;  %v4303_v46 = vunpack.i.h.bf16 %v4299_v0  ;;  %v4300_v63 = vunpack.i.l.bf16 %v4299_v0 }
 0x2cc   : > { %v3664_v48 = vpack.c.bf16 %v4303_v46, %v4300_v63 }
 0x2cd   : > { %v4304_v28 = vpop.trf.xlu0 }
 0x2ce   : > { %3234 = vst [vmem:[%s5981_s22 + $0x30] sm:$0xff] %v3664_v48  ;;  %v4308_v27 = vunpack.i.h.bf16 %v4304_v28  ;;  %v4305_v40 = vunpack.i.l.bf16 %v4304_v28 }
 0x2d0   : > { %v3665_v53 = vpack.c.bf16 %v4308_v27, %v4305_v40 }
 0x2d1   : > { %v4309_v50 = vpop.trf.xlu0 }
 0x2d2   : > { %3235 = vst [vmem:[%s5981_s22 + $0x38] sm:$0xff] %v3665_v53  ;;  %v4313_v59 = vunpack.i.h.bf16 %v4309_v50  ;;  %v4310_v23 = vunpack.i.l.bf16 %v4309_v50 }
 0x2d4   : > { %v3666_v30 = vpack.c.bf16 %v4313_v59, %v4310_v23 }
 0x2d5   : > { %v4314_v38 = vpop.trf.xlu0 }
 0x2d6   : > { %3236 = vst [vmem:[%s5981_s22 + $0x40] sm:$0xff] %v3666_v30  ;;  %v4318_v4 = vunpack.i.h.bf16 %v4314_v38  ;;  %v4315_v2 = vunpack.i.l.bf16 %v4314_v38 }
 0x2d8   : > { %v3667_v25 = vpack.c.bf16 %v4318_v4, %v4315_v2 }
 0x2d9   : > { %v4319_v20 = vpop.trf.xlu0 }
 0x2da   : > { %3237 = vst [vmem:[%s5981_s22 + $0x48] sm:$0xff] %v3667_v25  ;;  %v4323_v39 = vunpack.i.h.bf16 %v4319_v20  ;;  %v4320_v62 = vunpack.i.l.bf16 %v4319_v20 }
 0x2dc   : > { %v3668_v3 = vpack.c.bf16 %v4323_v39, %v4320_v62 }
 0x2dd   : > { %v4324_v55 = vpop.trf.xlu0 }
 0x2de   : > { %3238 = vst [vmem:[%s5981_s22 + $0x50] sm:$0xff] %v3668_v3  ;;  %v4328_v5 = vunpack.i.h.bf16 %v4324_v55  ;;  %v4325_v32 = vunpack.i.l.bf16 %v4324_v55 }
 0x2e0   : > { %v3669_v34 = vpack.c.bf16 %v4328_v5, %v4325_v32 }
 0x2e1   : > { %v4329_v9 = vpop.trf.xlu0 }
 0x2e2   : > { %3239 = vst [vmem:[%s5981_s22 + $0x58] sm:$0xff] %v3669_v34  ;;  %v4333_v21 = vunpack.i.h.bf16 %v4329_v9  ;;  %v4330_v29 = vunpack.i.l.bf16 %v4329_v9 }
 0x2e4   : > { %v3670_v10 = vpack.c.bf16 %v4333_v21, %v4330_v29 }
 0x2e5   : > { %v4334_v51 = vpop.trf.xlu0 }
 0x2e6   : > { %3240 = vst [vmem:[%s5981_s22 + $0x60] sm:$0xff] %v3670_v10  ;;  %v4338_v19 = vunpack.i.h.bf16 %v4334_v51  ;;  %v4335_v35 = vunpack.i.l.bf16 %v4334_v51 }
 0x2e8   : > { %v3671_v36 = vpack.c.bf16 %v4338_v19, %v4335_v35 }
 0x2e9   : > { %v4339_v47 = vpop.trf.xlu0 }
 0x2ea   : > { %3241 = vst [vmem:[%s5981_s22 + $0x68] sm:$0xff] %v3671_v36  ;;  %v4343_v56 = vunpack.i.h.bf16 %v4339_v47  ;;  %v4340_v6 = vunpack.i.l.bf16 %v4339_v47 }
 0x2ec   : > { %v3672_v44 = vpack.c.bf16 %v4343_v56, %v4340_v6 }
 0x2ed   : > { %v4344_v8 = vpop.trf.xlu0 }
 0x2ee   : > { %3242 = vst [vmem:[%s5981_s22 + $0x70] sm:$0xff] %v3672_v44  ;;  %v4348_v49 = vunpack.i.h.bf16 %v4344_v8  ;;  %v4345_v57 = vunpack.i.l.bf16 %v4344_v8 }
 0x2f0   : > { %v3673_v14 = vpack.c.bf16 %v4348_v49, %v4345_v57 }
 0x2f2   : > { %3243 = vst [vmem:[%s5981_s22 + $0x78] sm:$0xff] %v3673_v14 }
 0x2f3   : > { %4410 = shalt.err (!%p4407_p11)
}
 0x2f4   : > { %s4411_s6 = scalar_lea.hbm %s6146_s30, 2048  ;;  %s4415_s12 = scalar_lea.hbm %s6204_s2, 4096 }
 0x2f5   : > { %p4412_p12 = scmp.ne.s32.totalorder %s6146_s30, %s4411_s6  ;;  %p4416_p1 = scmp.lt.s32.totalorder %s6146_s30, %s6204_s2 }
 0x2f6   : > { %p4417_p3 = scmp.lt.s32.totalorder %s4415_s12, %s4411_s6 }
 0x2f7   : > { %p4413_p13 = pnand %p4412_p12, %p4556_p4 }
 0x2f8   : > { %p4418_p5 = por %p4417_p3, %p4416_p1 }
 0x2f9   : > { %p4414_p0 = pneg %p4413_p13 }
 0x2fb   : > { %p4419_p6 = pnand %p4418_p5, %p4414_p0 }
 0x2fd   : > { %4422 = shalt.err (!%p4419_p6)
}
 0x2fe   : > { %s4483_s21 = smov 128   ;;  %s4484_s24 = smov 8  }
 0x2ff   : > { %4147 = dma.vmem_to_hbm [thread:$0]  (%p4556_p4), %s6148_s7, 2048, %s6146_s30, %s6153_s5, %s4483_s21, %s4483_s21, %s4484_s24  }
 0x300   : > { %4448 = dma.done.wait (%p4546_p2), [#allocation5], 32  }
 0x301   : > { %4450 = vsyncadd (%p4546_p2), [#allocation5], 4294967264 }
 0x302 PF: > { %p4165_p7 = scmp.ge.s32.totalorder %s4477_s20, 2  ;;  %s3310_s27 = sand.u32 1, %s4457_s15  }
 0x303   : > { %s3311_s18 = scalar_lea.sflag [#allocation3], %s3310_s27 }
 0x304   : > { %p4158_p9 = pnand %p4165_p7, %p4563_p8 }
 0x306   : > { %p4159_p10 = pneg %p4158_p9 }
 0x308   : > { %4452 = dma.done.wait (%p4159_p10), %s3311_s18, 2048  }
 0x309   : > { %4454 = vsyncadd (%p4159_p10), %s3311_s18, 4294965248  ;;  %s19_s20 = sadd.s32 1, %s4477_s20   ;;  %s6328_s15 = smov %s4461_s16 }
 0x30a   : > { %p16_p4 = scmp.ge.s32.totalorder %s19_s20, 4   ;;  %s6329_s16 = smov %s4465_s17 }
 0x30b   : > { %s6330_s17 = smov %s4569_s29  ;;  %s6331_s18 = smov %s4473_s19 }
 0x30c   : > { %s6332_s19 = smov %s6334_s23  ;;  %18 = sbr.rel (!%p16_p4) target bundleno = 5 (0x5), region = 96 }
 0x311   :  { %3316 = vsyncpa [#allocation3], 1 }
 0x312   :  { %3318 = vsyncpa [#allocation3 + $0x1], 1 }
 0x313   :  { %3319 = vsyncpa [#allocation5], 1 }

</bundles_post_ra>
